<compile_context>
chip_gen: v7x
topology: tpu7x:2x2x1
jax: 0.10.0
libtpu: 0.0.40
codegen_flags: <defaults>
</compile_context>

<pallas_src>
import jax
import jax.numpy as jnp
from jax.experimental import pallas as pl
from jax.experimental.pallas import tpu as pltpu

IN_FEATURES = 28 * 28          # 784 -- no K padding; ragged MXU tail is free (DMA-bound)
HIDDEN = 512
OUT_FEATURES = 10
OUT_PAD = 128                  # lane-dense output tile (10 padded to 128)


def mlp_kernel(x_ref, w1_ref, s1_ref, b1_ref, w2_ref, s2_ref, b2_ref,
               w3_ref, s3_ref, b3_ref, o_ref):
    """One batch tile: three Linear(+ReLU) layers; int8 weights dequantized in-kernel."""
    x = x_ref[...]                                           # (tm, 784) bf16

    # Layer 1: Linear(784 -> 512) + ReLU. int8 -> bf16 dequant is a VPU cast; the
    # per-output-channel scale folds into the f32 epilogue together with the bias.
    h1 = jnp.dot(x, w1_ref[...].astype(jnp.bfloat16),
                 preferred_element_type=jnp.float32)
    h1 = jnp.maximum(h1 * s1_ref[...] + b1_ref[...], 0.0)

    # Layer 2: Linear(512 -> 512) + ReLU
    h2 = jnp.dot(h1.astype(jnp.bfloat16), w2_ref[...].astype(jnp.bfloat16),
                 preferred_element_type=jnp.float32)
    h2 = jnp.maximum(h2 * s2_ref[...] + b2_ref[...], 0.0)

    # Layer 3: Linear(512 -> 10) into a lane-dense (tm, 128) tile (cols 10..127 zero)
    logits = jnp.dot(h2.astype(jnp.bfloat16), w3_ref[...].astype(jnp.bfloat16),
                     preferred_element_type=jnp.float32)
    o_ref[...] = (logits * s3_ref[...] + b3_ref[...]).astype(o_ref.dtype)


def _round_up(n, m):
    return -(-n // m) * m


def _select_batch_tile(batch):
    # Small/medium B: one tile sized to the batch (bf16 sublane pack = 16) so we
    # never DMA a 128-row tile for an 8-row batch, and the whole weight set is
    # fetched exactly once on one TensorCore.
    # Large B: 256-row tiles fill the 256-wide MXU (v6e/v7x), halve the grid-step
    # count vs 128, and give the v7x megacore >= 2 tiles to split.
    if batch <= 256:
        return max(16, _round_up(batch, 16))
    return 256


def neural_network_forward(x, packed_params):
    """x: (B, 28, 28) float32. Returns logits (B, 10) float32."""
    w1q, s1, b1, w2q, s2, b2, w3q, s3, b3 = packed_params
    B = x.shape[0]
    tm = _select_batch_tile(B)
    b_pad = _round_up(B, tm)

    # nn.Flatten() + bf16 cast + (optional) batch pad, fused in the wrapper.
    x_flat = x.reshape(B, IN_FEATURES).astype(jnp.bfloat16)
    if b_pad != B:
        x_flat = jnp.pad(x_flat, ((0, b_pad - B), (0, 0)))

    grid = (b_pad // tm,)
    const = lambda i: (0, 0)       # weights/scales/biases: VMEM-resident across batch tiles

    out = pl.pallas_call(
        mlp_kernel,
        out_shape=jax.ShapeDtypeStruct((b_pad, OUT_PAD), jnp.float32),
        grid_spec=pltpu.PrefetchScalarGridSpec(
            num_scalar_prefetch=0,
            grid=grid,
            in_specs=[
                pl.BlockSpec((tm, IN_FEATURES), lambda i: (i, 0)),   # x: batch-tiled, bf16
                pl.BlockSpec((IN_FEATURES, HIDDEN), const),          # w1 int8
                pl.BlockSpec((1, HIDDEN), const),                    # s1 f32
                pl.BlockSpec((1, HIDDEN), const),                    # b1 f32
                pl.BlockSpec((HIDDEN, HIDDEN), const),               # w2 int8
                pl.BlockSpec((1, HIDDEN), const),                    # s2 f32
                pl.BlockSpec((1, HIDDEN), const),                    # b2 f32
                pl.BlockSpec((HIDDEN, OUT_PAD), const),              # w3 int8 (lane-padded)
                pl.BlockSpec((1, OUT_PAD), const),                   # s3 f32 (lane-padded)
                pl.BlockSpec((1, OUT_PAD), const),                   # b3 f32 (lane-padded)
            ],
            out_specs=pl.BlockSpec((tm, OUT_PAD), lambda i: (i, 0)),
        ),
        compiler_params=pltpu.CompilerParams(
            dimension_semantics=("parallel",),   # batch tiles split across TCs when grid >= 2
            vmem_limit_bytes=16 << 20,           # right-sized; ~2-4 MiB actually used
        ),
    )(x_flat, w1q, s1, b1, w2q, s2, b2, w3q, s3, b3)

    return out[:B, :OUT_FEATURES]


def init_params(key):
    """Raw f32 parameters with the module's shapes, stored as (in, out)."""
    k1, k2, k3, k4, k5, k6 = jax.random.split(key, 6)
    s1 = 1.0 / jnp.sqrt(IN_FEATURES)
    s2 = 1.0 / jnp.sqrt(HIDDEN)
    w1 = jax.random.uniform(k1, (IN_FEATURES, HIDDEN), jnp.float32, -s1, s1)
    b1 = jax.random.uniform(k2, (1, HIDDEN), jnp.float32, -s1, s1)
    w2 = jax.random.uniform(k3, (HIDDEN, HIDDEN), jnp.float32, -s2, s2)
    b2 = jax.random.uniform(k4, (1, HIDDEN), jnp.float32, -s2, s2)
    w3 = jax.random.uniform(k5, (HIDDEN, OUT_FEATURES), jnp.float32, -s2, s2)
    b3 = jax.random.uniform(k6, (1, OUT_FEATURES), jnp.float32, -s2, s2)
    return (w1, b1, w2, b2, w3, b3)


def _quantize_per_out_channel(w):
    """Symmetric int8 quantization with a per-output-column f32 scale."""
    amax = jnp.max(jnp.abs(w), axis=0, keepdims=True)
    scale = jnp.where(amax > 0, amax / 127.0, 1.0).astype(jnp.float32)
    q = jnp.clip(jnp.round(w / scale), -127, 127).astype(jnp.int8)
    return q, scale


def pack_params(raw):
    """Quantize weights (int8 + per-channel scale); pad layer 3 to a lane-dense 128.

    Note: on v7x an fp8-e4m3 weight packing would be MXU-native; the int8 +
    in-kernel dequant-to-bf16 path used here is portable across v5e/v6e/v7x and
    gives the same 2x reduction in the binding weight-DMA stream.
    """
    w1, b1, w2, b2, w3, b3 = raw
    w1q, s1 = _quantize_per_out_channel(w1)
    w2q, s2 = _quantize_per_out_channel(w2)
    w3q, s3 = _quantize_per_out_channel(w3)
    pad_n = OUT_PAD - OUT_FEATURES
    w3q = jnp.pad(w3q, ((0, 0), (0, pad_n)))                       # zero weight cols
    s3 = jnp.pad(s3, ((0, 0), (0, pad_n)), constant_values=1.0)    # harmless scale on zeros
    b3 = jnp.pad(b3, ((0, 0), (0, pad_n)))                         # zero bias cols
    return (w1q, s1, b1, w2q, s2, b2, w3q, s3, b3)


if __name__ == "__main__":
    key = jax.random.PRNGKey(0)
    kx, kp = jax.random.split(key)

    B = 8
    x = jax.random.uniform(kx, (B, 28, 28), jnp.float32)   # like torch.rand
    raw_params = init_params(kp)
    packed = pack_params(raw_params)

    logits = neural_network_forward(x, packed)
    jax.block_until_ready(logits)
    assert logits.shape == (B, OUT_FEATURES)

    # --- Matched-precision reference (same int8-dequant / bf16-MXU / f32-acc path) ---
    w1q, s1, b1, w2q, s2, b2, w3q, s3, b3 = packed
    xb = x.reshape(B, IN_FEATURES).astype(jnp.bfloat16)
    h = jnp.dot(xb, w1q.astype(jnp.bfloat16), preferred_element_type=jnp.float32)
    h = jnp.maximum(h * s1 + b1, 0.0)
    h = jnp.dot(h.astype(jnp.bfloat16), w2q.astype(jnp.bfloat16),
                preferred_element_type=jnp.float32)
    h = jnp.maximum(h * s2 + b2, 0.0)
    ref_q = (jnp.dot(h.astype(jnp.bfloat16), w3q.astype(jnp.bfloat16),
                     preferred_element_type=jnp.float32) * s3 + b3)[:, :OUT_FEATURES]
    assert jnp.allclose(logits, ref_q, atol=2e-3, rtol=2e-3)

    # --- Loose check against the pure-f32 torch-equivalent math.
    # Accepted precision contract: bf16 activations + per-channel int8 weights vs
    # the f32 nn.Module (error ~1e-3 on logits of O(0.1-1) magnitude).
    w1, b1f, w2, b2f, w3, b3f = raw_params
    x2 = x.reshape(B, IN_FEATURES)
    ref_f32 = jnp.maximum(x2 @ w1 + b1f, 0.0)
    ref_f32 = jnp.maximum(ref_f32 @ w2 + b2f, 0.0)
    ref_f32 = ref_f32 @ w3 + b3f
    assert jnp.allclose(logits, ref_f32, atol=0.25, rtol=0.1)

    print("KERNEL_OK")
</pallas_src>

<mosaic_0001>
module attributes {stable_mosaic.version = 11 : i64} {
  func.func @mlp_kernel(%arg0: i32, %arg1: memref<16x784xbf16, #tpu.memory_space<vmem>>, %arg2: memref<784x512xi8, #tpu.memory_space<vmem>>, %arg3: memref<1x512xf32, #tpu.memory_space<vmem>>, %arg4: memref<1x512xf32, #tpu.memory_space<vmem>>, %arg5: memref<512x512xi8, #tpu.memory_space<vmem>>, %arg6: memref<1x512xf32, #tpu.memory_space<vmem>>, %arg7: memref<1x512xf32, #tpu.memory_space<vmem>>, %arg8: memref<512x128xi8, #tpu.memory_space<vmem>>, %arg9: memref<1x128xf32, #tpu.memory_space<vmem>>, %arg10: memref<1x128xf32, #tpu.memory_space<vmem>>, %arg11: memref<16x128xf32, #tpu.memory_space<vmem>>) attributes {dimension_semantics = [#tpu.dimension_semantics<parallel>], iteration_bounds = array<i64: 1>, scalar_prefetch = 0 : i64, scratch_operands = 0 : i64, tpu.core_type = #tpu.core_type<tc>, window_params = [{transform_indices = @transform_0, window_bounds = array<i64: 16, 784>}, {pipeline_mode = #tpu.pipeline_mode<synchronous>, transform_indices = @transform_1, window_bounds = array<i64: 784, 512>}, {pipeline_mode = #tpu.pipeline_mode<synchronous>, transform_indices = @transform_2, window_bounds = array<i64: 1, 512>}, {pipeline_mode = #tpu.pipeline_mode<synchronous>, transform_indices = @transform_3, window_bounds = array<i64: 1, 512>}, {pipeline_mode = #tpu.pipeline_mode<synchronous>, transform_indices = @transform_4, window_bounds = array<i64: 512, 512>}, {pipeline_mode = #tpu.pipeline_mode<synchronous>, transform_indices = @transform_5, window_bounds = array<i64: 1, 512>}, {pipeline_mode = #tpu.pipeline_mode<synchronous>, transform_indices = @transform_6, window_bounds = array<i64: 1, 512>}, {pipeline_mode = #tpu.pipeline_mode<synchronous>, transform_indices = @transform_7, window_bounds = array<i64: 512, 128>}, {pipeline_mode = #tpu.pipeline_mode<synchronous>, transform_indices = @transform_8, window_bounds = array<i64: 1, 128>}, {pipeline_mode = #tpu.pipeline_mode<synchronous>, transform_indices = @transform_9, window_bounds = array<i64: 1, 128>}, {transform_indices = @transform_10, window_bounds = array<i64: 16, 128>}]} {
    %c0 = arith.constant 0 : index
    %c0_0 = arith.constant 0 : index
    %0 = vector.load %arg1[%c0, %c0_0] : memref<16x784xbf16, #tpu.memory_space<vmem>>, vector<16x784xbf16>
    %c0_1 = arith.constant 0 : index
    %c0_2 = arith.constant 0 : index
    %1 = vector.load %arg2[%c0_1, %c0_2] : memref<784x512xi8, #tpu.memory_space<vmem>>, vector<784x512xi8>
    %2 = arith.sitofp %1 : vector<784x512xi8> to vector<784x512xbf16>
    %cst = arith.constant dense<0.000000e+00> : vector<16x512xf32>
    %3 = tpu.matmul %0, %2, %cst {dimension_numbers = #tpu.dot_dimension_numbers<[1], [0], [0], [1], [0, 0, 1, 1], [], []>} : vector<16x784xbf16>, vector<784x512xbf16>, vector<16x512xf32> -> vector<16x512xf32>
    %c0_3 = arith.constant 0 : index
    %c0_4 = arith.constant 0 : index
    %4 = vector.load %arg3[%c0_3, %c0_4] : memref<1x512xf32, #tpu.memory_space<vmem>>, vector<1x512xf32>
    %5 = vector.broadcast %4 : vector<1x512xf32> to vector<16x512xf32>
    %6 = arith.mulf %3, %5 : vector<16x512xf32>
    %c0_5 = arith.constant 0 : index
    %c0_6 = arith.constant 0 : index
    %7 = vector.load %arg4[%c0_5, %c0_6] : memref<1x512xf32, #tpu.memory_space<vmem>>, vector<1x512xf32>
    %8 = vector.broadcast %7 : vector<1x512xf32> to vector<16x512xf32>
    %9 = arith.addf %6, %8 : vector<16x512xf32>
    %cst_7 = arith.constant 0.000000e+00 : f32
    %10 = vector.broadcast %cst_7 : f32 to vector<16x512xf32>
    %11 = arith.maximumf %9, %10 : vector<16x512xf32>
    %12 = arith.truncf %11 : vector<16x512xf32> to vector<16x512xbf16>
    %c0_8 = arith.constant 0 : index
    %c0_9 = arith.constant 0 : index
    %13 = vector.load %arg5[%c0_8, %c0_9] : memref<512x512xi8, #tpu.memory_space<vmem>>, vector<512x512xi8>
    %14 = arith.sitofp %13 : vector<512x512xi8> to vector<512x512xbf16>
    %cst_10 = arith.constant dense<0.000000e+00> : vector<16x512xf32>
    %15 = tpu.matmul %12, %14, %cst_10 {dimension_numbers = #tpu.dot_dimension_numbers<[1], [0], [0], [1], [0, 0, 1, 1], [], []>} : vector<16x512xbf16>, vector<512x512xbf16>, vector<16x512xf32> -> vector<16x512xf32>
    %c0_11 = arith.constant 0 : index
    %c0_12 = arith.constant 0 : index
    %16 = vector.load %arg6[%c0_11, %c0_12] : memref<1x512xf32, #tpu.memory_space<vmem>>, vector<1x512xf32>
    %17 = vector.broadcast %16 : vector<1x512xf32> to vector<16x512xf32>
    %18 = arith.mulf %15, %17 : vector<16x512xf32>
    %c0_13 = arith.constant 0 : index
    %c0_14 = arith.constant 0 : index
    %19 = vector.load %arg7[%c0_13, %c0_14] : memref<1x512xf32, #tpu.memory_space<vmem>>, vector<1x512xf32>
    %20 = vector.broadcast %19 : vector<1x512xf32> to vector<16x512xf32>
    %21 = arith.addf %18, %20 : vector<16x512xf32>
    %cst_15 = arith.constant 0.000000e+00 : f32
    %22 = vector.broadcast %cst_15 : f32 to vector<16x512xf32>
    %23 = arith.maximumf %21, %22 : vector<16x512xf32>
    %24 = arith.truncf %23 : vector<16x512xf32> to vector<16x512xbf16>
    %c0_16 = arith.constant 0 : index
    %c0_17 = arith.constant 0 : index
    %25 = vector.load %arg8[%c0_16, %c0_17] : memref<512x128xi8, #tpu.memory_space<vmem>>, vector<512x128xi8>
    %26 = arith.sitofp %25 : vector<512x128xi8> to vector<512x128xbf16>
    %cst_18 = arith.constant dense<0.000000e+00> : vector<16x128xf32>
    %27 = tpu.matmul %24, %26, %cst_18 {dimension_numbers = #tpu.dot_dimension_numbers<[1], [0], [0], [1], [0, 0, 1, 1], [], []>} : vector<16x512xbf16>, vector<512x128xbf16>, vector<16x128xf32> -> vector<16x128xf32>
    %c0_19 = arith.constant 0 : index
    %c0_20 = arith.constant 0 : index
    %28 = vector.load %arg9[%c0_19, %c0_20] : memref<1x128xf32, #tpu.memory_space<vmem>>, vector<1x128xf32>
    %29 = vector.broadcast %28 : vector<1x128xf32> to vector<16x128xf32>
    %30 = arith.mulf %27, %29 : vector<16x128xf32>
    %c0_21 = arith.constant 0 : index
    %c0_22 = arith.constant 0 : index
    %31 = vector.load %arg10[%c0_21, %c0_22] : memref<1x128xf32, #tpu.memory_space<vmem>>, vector<1x128xf32>
    %32 = vector.broadcast %31 : vector<1x128xf32> to vector<16x128xf32>
    %33 = arith.addf %30, %32 : vector<16x128xf32>
    %c0_23 = arith.constant 0 : index
    %c0_24 = arith.constant 0 : index
    %34 = vector.load %arg11[%c0_23, %c0_24] : memref<16x128xf32, #tpu.memory_space<vmem>>, vector<16x128xf32>
    tpu.vector_store %arg11[%c0_23, %c0_24], %33 {strides = array<i32>} : memref<16x128xf32, #tpu.memory_space<vmem>>, vector<16x128xf32>,
    return
  }
  func.func @transform_0(%arg0: i32) -> (i32, i32) {
    %c0_i32 = arith.constant 0 : i32
    %c0_i32_0 = arith.constant 0 : i32
    return %arg0, %c0_i32 : i32, i32
  }
  func.func @transform_1(%arg0: i32) -> (i32, i32) {
    %c0_i32 = arith.constant 0 : i32
    %c0_i32_0 = arith.constant 0 : i32
    %c0_i32_1 = arith.constant 0 : i32
    return %c0_i32, %c0_i32_0 : i32, i32
  }
  func.func @transform_2(%arg0: i32) -> (i32, i32) {
    %c0_i32 = arith.constant 0 : i32
    %c0_i32_0 = arith.constant 0 : i32
    %c0_i32_1 = arith.constant 0 : i32
    return %c0_i32, %c0_i32_0 : i32, i32
  }
  func.func @transform_3(%arg0: i32) -> (i32, i32) {
    %c0_i32 = arith.constant 0 : i32
    %c0_i32_0 = arith.constant 0 : i32
    %c0_i32_1 = arith.constant 0 : i32
    return %c0_i32, %c0_i32_0 : i32, i32
  }
  func.func @transform_4(%arg0: i32) -> (i32, i32) {
    %c0_i32 = arith.constant 0 : i32
    %c0_i32_0 = arith.constant 0 : i32
    %c0_i32_1 = arith.constant 0 : i32
    return %c0_i32, %c0_i32_0 : i32, i32
  }
  func.func @transform_5(%arg0: i32) -> (i32, i32) {
    %c0_i32 = arith.constant 0 : i32
    %c0_i32_0 = arith.constant 0 : i32
    %c0_i32_1 = arith.constant 0 : i32
    return %c0_i32, %c0_i32_0 : i32, i32
  }
  func.func @transform_6(%arg0: i32) -> (i32, i32) {
    %c0_i32 = arith.constant 0 : i32
    %c0_i32_0 = arith.constant 0 : i32
    %c0_i32_1 = arith.constant 0 : i32
    return %c0_i32, %c0_i32_0 : i32, i32
  }
  func.func @transform_7(%arg0: i32) -> (i32, i32) {
    %c0_i32 = arith.constant 0 : i32
    %c0_i32_0 = arith.constant 0 : i32
    %c0_i32_1 = arith.constant 0 : i32
    return %c0_i32, %c0_i32_0 : i32, i32
  }
  func.func @transform_8(%arg0: i32) -> (i32, i32) {
    %c0_i32 = arith.constant 0 : i32
    %c0_i32_0 = arith.constant 0 : i32
    %c0_i32_1 = arith.constant 0 : i32
    return %c0_i32, %c0_i32_0 : i32, i32
  }
  func.func @transform_9(%arg0: i32) -> (i32, i32) {
    %c0_i32 = arith.constant 0 : i32
    %c0_i32_0 = arith.constant 0 : i32
    %c0_i32_1 = arith.constant 0 : i32
    return %c0_i32, %c0_i32_0 : i32, i32
  }
  func.func @transform_10(%arg0: i32) -> (i32, i32) {
    %c0_i32 = arith.constant 0 : i32
    %c0_i32_0 = arith.constant 0 : i32
    return %arg0, %c0_i32 : i32, i32
  }
}

</mosaic_0001>

<bundles_post_ra>
// kernel: tpu_custom_call.1
= control target key start
LH: loop header
LB: loop body
LE: loop exit
PB: predicated region body
PF: predicated region fallthrough
CT: control target
= control target key end

     0   :  { %15 = vsyncpa [#allocation3], 0  ;;  %s3047_s0 = inlined_call_operand.hbm [shape: bf16[16,784], index: 0, kind: input, shape index: {}]   ;;  %s3048_s1 = inlined_call_operand.hbm [shape: s8[784,512], index: 1, kind: input, shape index: {}]   ;;  %s3049_s2 = inlined_call_operand.vmem [shape: f32[1,512], index: 2, kind: input, shape index: {}]   ;;  %s3050_s3 = inlined_call_operand.vmem [shape: f32[1,512], index: 3, kind: input, shape index: {}]   ;;  %s3051_s4 = inlined_call_operand.hbm [shape: s8[512,512], index: 4, kind: input, shape index: {}]   ;;  %s3052_s5 = inlined_call_operand.vmem [shape: f32[1,512], index: 5, kind: input, shape index: {}]   ;;  %s3053_s6 = inlined_call_operand.vmem [shape: f32[1,512], index: 6, kind: input, shape index: {}]   ;;  %s3054_s7 = inlined_call_operand.hbm [shape: s8[512,128], index: 7, kind: input, shape index: {}]   ;;  %s3055_s8 = inlined_call_operand.vmem [shape: f32[1,128], index: 8, kind: input, shape index: {}]   ;;  %s3056_s9 = inlined_call_operand.vmem [shape: f32[1,128], index: 9, kind: input, shape index: {}]   ;;  %s3057_s10 = inlined_call_operand.hbm [shape: f32[16,128], index: 10, kind: output, shape index: {}]  }
   0x1   :  { %16 = vsyncpa [#allocation6], 0 }
   0x2   :  { %17 = vsyncpa [#allocation9], 0 }
   0x3   :  { %18 = vsyncpa [#allocation4], 0  ;;  %s2857_s13 = smov [#allocation5]   ;;  %s2739_s17 = scalar_lea.hbm %s3048_s1, 12544 }
   0x4   :  { %s36_s14 = sshll.u32 %s2857_s13, 4  ;;  %p2740_p0 = scmp.ne.s32.totalorder %s3048_s1, %s2739_s17  ;;  %s37_s14 = int_to_ptr.vmem [resolvable:$true] %s36_s14 }
   0x5   :  { %p2743_p1 = scmp.lt.u32.totalorder %s2739_s17, %s3048_s1 }
   0x7   :  { %p2745_p2 = pnand %p2743_p1, %p2740_p0 }
   0x9   :  { %2748 = shalt.err (!%p2745_p2)
}
   0xa   :  { %s2749_s22 = scalar_lea.vmem %s37_s14, 12544  ;;  %p2754_p4 = scmp.lt.s32.totalorder %s37_s14, %s37_s14 }
   0xb   :  { %p2750_p3 = scmp.ne.s32.totalorder %s37_s14, %s2749_s22  ;;  %p2755_p5 = scmp.lt.s32.totalorder %s2749_s22, %s2749_s22 }
   0xd   :  { %p2756_p6 = por %p2755_p5, %p2754_p4 }
   0xf   :  { %p2757_p7 = pnand %p2756_p6, %p2750_p3 }
  0x11   :  { %2760 = shalt.err (!%p2757_p7)
}
  0x12   :  { %s2858_s23 = smov 128   ;;  %s2859_s24 = smov 8  }
  0x13   :  { %42 = dma.hbm_to_vmem [thread:$0]  %s3048_s1, 12544, %s37_s14, [#allocation6], %s2858_s23, %s2858_s23, %s2859_s24  }
  0x14   :  { %s2860_s27 = smov [#allocation2]   ;;  %s2761_s11 = scalar_lea.hbm %s3047_s0, 896 }
  0x15   :  { %s24_s28 = sshll.u32 %s2860_s27, 4  ;;  %p2762_p8 = scmp.ne.s32.totalorder %s3047_s0, %s2761_s11  ;;  %s25_s28 = int_to_ptr.vmem [resolvable:$true] %s24_s28 }
  0x16   :  { %p2765_p9 = scmp.lt.u32.totalorder %s2761_s11, %s3047_s0 }
  0x18   :  { %p2767_p10 = pnand %p2765_p9, %p2762_p8 }
  0x1a   :  { %2770 = shalt.err (!%p2767_p10)
}
  0x1b   :  { %s2771_s17 = scalar_lea.vmem %s25_s28, 896  ;;  %p2776_p12 = scmp.lt.s32.totalorder %s25_s28, %s25_s28 }
  0x1c   :  { %p2772_p11 = scmp.ne.s32.totalorder %s25_s28, %s2771_s17  ;;  %p2777_p13 = scmp.lt.s32.totalorder %s2771_s17, %s2771_s17 }
  0x1e   :  { %p2778_p0 = por %p2777_p13, %p2776_p12 }
  0x20   :  { %p2779_p1 = pnand %p2778_p0, %p2772_p11 }
  0x22   :  { %2782 = shalt.err (!%p2779_p1)
}
  0x23   :  { %s2861_s1 = smov 448   ;;  %s2862_s14 = smov 28  }
  0x24   :  { %30 = dma.hbm_to_vmem [thread:$0]  %s3047_s0, 896, %s25_s28, [#allocation3], %s2861_s1, %s2861_s1, %s2862_s14  }
  0x25   :  { %s2863_s20 = smov [#allocation7]   ;;  %s2783_s26 = scalar_lea.hbm %s3051_s4, 8192 }
  0x26   :  { %s52_s21 = sshll.u32 %s2863_s20, 4  ;;  %p2784_p2 = scmp.ne.s32.totalorder %s3051_s4, %s2783_s26  ;;  %s53_s21 = int_to_ptr.vmem [resolvable:$true] %s52_s21 }
  0x27   :  { %p2787_p3 = scmp.lt.u32.totalorder %s2783_s26, %s3051_s4 }
  0x29   :  { %p2789_p4 = pnand %p2787_p3, %p2784_p2 }
  0x2b   :  { %2792 = shalt.err (!%p2789_p4)
}
  0x2c   :  { %s2793_s12 = scalar_lea.vmem %s53_s21, 8192  ;;  %p2798_p6 = scmp.lt.s32.totalorder %s53_s21, %s53_s21 }
  0x2d   :  { %p2794_p5 = scmp.ne.s32.totalorder %s53_s21, %s2793_s12  ;;  %p2799_p7 = scmp.lt.s32.totalorder %s2793_s12, %s2793_s12 }
  0x2f   :  { %p2800_p8 = por %p2799_p7, %p2798_p6 }
  0x31   :  { %p2801_p9 = pnand %p2800_p8, %p2794_p5 }
  0x33   :  { %2804 = shalt.err (!%p2801_p9)
}
  0x34   :  { %s2864_s0 = smov 512   ;;  %s2865_s28 = smov 32  }
  0x35   :  { %58 = dma.hbm_to_vmem [thread:$0]  %s3051_s4, 8192, %s53_s21, [#allocation6], %s2864_s0, %s2864_s0, %s2865_s28  }
  0x36   :  { %s2866_s16 = smov [#allocation8]   ;;  %s2805_s18 = scalar_lea.hbm %s3054_s7, 2048 }
  0x37   :  { %s68_s17 = sshll.u32 %s2866_s16, 4  ;;  %p2806_p10 = scmp.ne.s32.totalorder %s3054_s7, %s2805_s18  ;;  %s69_s17 = int_to_ptr.vmem [resolvable:$true] %s68_s17 }
  0x38   :  { %p2809_p11 = scmp.lt.u32.totalorder %s2805_s18, %s3054_s7 }
  0x3a   :  { %p2811_p12 = pnand %p2809_p11, %p2806_p10 }
  0x3c   :  { %2814 = shalt.err (!%p2811_p12)
}
  0x3d   :  { %s2815_s26 = scalar_lea.vmem %s69_s17, 2048  ;;  %p2820_p0 = scmp.lt.s32.totalorder %s69_s17, %s69_s17 }
  0x3e   :  { %p2816_p13 = scmp.ne.s32.totalorder %s69_s17, %s2815_s26  ;;  %p2821_p1 = scmp.lt.s32.totalorder %s2815_s26, %s2815_s26 }
  0x40   :  { %p2822_p2 = por %p2821_p1, %p2820_p0 }
  0x42   :  { %p2823_p3 = pnand %p2822_p2, %p2816_p13 }
  0x44   :  { %2826 = shalt.err (!%p2823_p3)
}
  0x45   :  { %74 = dma.hbm_to_vmem [thread:$0]  %s3054_s7, 2048, %s69_s17, [#allocation9], %s2858_s23, %s2858_s23, %s2859_s24  }
  0x46   :  { %2849 = dma.done.wait [#allocation3], 896  }
  0x47   :  { %2850 = vsyncadd [#allocation3], 4294966400 }
  0x48   :  { %2851 = dma.done.wait [#allocation6], 20736  }
  0x49   :  { %2852 = vsyncadd [#allocation6], 4294946560 }
  0x4a   :  { %2853 = dma.done.wait [#allocation9], 2048  }
  0x4b   :  { %2854 = vsyncadd [#allocation9], 4294965248  ;;  %v100_v0 = vld [vmem:[#allocation5] sm:$0xff]  ;;  %v101_v1 = vld [vmem:[#allocation5 + $0x8] sm:$0xff]  ;;  %vm1409_vm0 = vcmask 130048   ;;  %s2868_s13 = smov [#allocation10]  }
  0x4c   :  { %v102_v2 = vld [vmem:[#allocation5 + $0x10] sm:$0xff]  ;;  %v198_v3 = vunpack.c.l.s8.bf16 %v100_v0  ;;  %v200_v4 = vunpack.c.l.s8.bf16 %v101_v1  ;;  %v199_v5 = vunpack.c.h.s8.bf16 %v100_v0  ;;  %v201_v6 = vunpack.c.h.s8.bf16 %v101_v1  ;;  %v103_v7 = vld [vmem:[#allocation5 + $0x18] sm:$0xff]  ;;  %v104_v12 = vld [vmem:[#allocation5 + $0x20] sm:$0xff]  ;;  %s2420_s15 = sshll.u32 %s2868_s13, 4  ;;  %s2421_s15 = int_to_ptr.vmem [resolvable:$true] %s2420_s15 }
  0x4d   :  { %v202_v8 = vunpack.c.l.s8.bf16 %v102_v2  ;;  %v204_v9 = vunpack.c.l.s8.bf16 %v103_v7  ;;  %v203_v10 = vunpack.c.h.s8.bf16 %v102_v2  ;;  %v205_v11 = vunpack.c.h.s8.bf16 %v103_v7  ;;  %v105_v13 = vld [vmem:[#allocation5 + $0x28] sm:$0xff]  ;;  %v106_v18 = vld [vmem:[#allocation5 + $0x30] sm:$0xff]  ;;  %v107_v19 = vld [vmem:[#allocation5 + $0x38] sm:$0xff]  ;;  %p2832_p5 = scmp.lt.s32.totalorder %s2421_s15, %s2421_s15 }
  0x4e   :  { %v2442_v14 = vcombine.high %v198_v3, %v200_v4  ;;  %v2444_v15 = vcombine.high %v199_v5, %v201_v6  ;;  %v2441_v16 = vcombine.low %v198_v3, %v200_v4  ;;  %v2443_v17 = vcombine.low %v199_v5, %v201_v6  ;;  %v108_v34 = vld [vmem:[#allocation5 + $0x40] sm:$0xff]  ;;  %v109_v35 = vld [vmem:[#allocation5 + $0x48] sm:$0xff]  ;;  %v110_v40 = vld [vmem:[#allocation5 + $0x50] sm:$0xff] }
  0x4f   :  { %v2446_v20 = vcombine.high %v202_v8, %v204_v9  ;;  %v2448_v21 = vcombine.high %v203_v10, %v205_v11  ;;  %v206_v22 = vunpack.c.l.s8.bf16 %v104_v12  ;;  %v208_v23 = vunpack.c.l.s8.bf16 %v105_v13  ;;  %v111_v45 = vld [vmem:[#allocation5 + $0x58] sm:$0xff]  ;;  %v2731_v46 = vld [vmem:[#allocation2 + $0x4] ss:$28 sps:$4 sm:$0xff]   ;;  %v112_v55 = vld [vmem:[#allocation5 + $0x60] sm:$0xff] }
  0x50   :  { %1413 = vmatprep.subr.bf16.mxu0 %v2442_v14  ;;  %1585 = vmatprep.subr.bf16.mxu1 %v2444_v15  ;;  %v207_v24 = vunpack.c.h.s8.bf16 %v104_v12  ;;  %v209_v25 = vunpack.c.h.s8.bf16 %v105_v13  ;;  %v2445_v26 = vcombine.low %v202_v8, %v204_v9  ;;  %v2447_v27 = vcombine.low %v203_v10, %v205_v11  ;;  %v113_v56 = vld [vmem:[#allocation5 + $0x68] sm:$0xff]  ;;  %v114_v1 = vld [vmem:[#allocation5 + $0x70] sm:$0xff]  ;;  %v115_v2 = vld [vmem:[#allocation5 + $0x78] sm:$0xff] }
  0x51   :  { %1414 = vmatpush1.bf16.msra.mxu0 %v2441_v16  ;;  %1586 = vmatpush1.bf16.msra.mxu1 %v2443_v17  ;;  %v210_v28 = vunpack.c.l.s8.bf16 %v106_v18  ;;  %v212_v29 = vunpack.c.l.s8.bf16 %v107_v19  ;;  %v2450_v30 = vcombine.high %v206_v22, %v208_v23  ;;  %v211_v32 = vunpack.c.h.s8.bf16 %v106_v18  ;;  %v116_v11 = vld [vmem:[#allocation5 + $0x80] sm:$0xff]  ;;  %v117_v12 = vld [vmem:[#allocation5 + $0x88] sm:$0xff] }
  0x52   :  { %1415 = vmatprep.subr.bf16.mxu0 %v2446_v20  ;;  %1587 = vmatprep.subr.bf16.mxu1 %v2448_v21  ;;  %v2452_v31 = vcombine.high %v207_v24, %v209_v25  ;;  %v213_v33 = vunpack.c.h.s8.bf16 %v107_v19  ;;  %v2449_v36 = vcombine.low %v206_v22, %v208_v23  ;;  %v2451_v37 = vcombine.low %v207_v24, %v209_v25  ;;  %v118_v21 = vld [vmem:[#allocation5 + $0x90] sm:$0xff]  ;;  %v119_v22 = vld [vmem:[#allocation5 + $0x98] sm:$0xff] }
  0x53   :  { %v2454_v38 = vcombine.high %v210_v28, %v212_v29  ;;  %v214_v39 = vunpack.c.l.s8.bf16 %v108_v34  ;;  %v216_v42 = vunpack.c.l.s8.bf16 %v109_v35  ;;  %v215_v43 = vunpack.c.h.s8.bf16 %v108_v34  ;;  %1445 = vmatprep.mubr.bf16.mxu0 %v2731_v46  ;;  %1617 = vmatprep.mubr.bf16.mxu1 %v2731_v46 }
  0x54   :  { %v2456_v41 = vcombine.high %v211_v32, %v213_v33  ;;  %v217_v44 = vunpack.c.h.s8.bf16 %v109_v35  ;;  %v2453_v47 = vcombine.low %v210_v28, %v212_v29  ;;  %v2455_v48 = vcombine.low %v211_v32, %v213_v33  ;;  %v121_v32 = vld [vmem:[#allocation5 + $0xa8] sm:$0xff] }
  0x55   :  { %1416 = vmatpush1.bf16.msra.mxu0 %v2445_v26  ;;  %1588 = vmatpush1.bf16.msra.mxu1 %v2447_v27  ;;  %v218_v49 = vunpack.c.l.s8.bf16 %v110_v40  ;;  %v220_v50 = vunpack.c.l.s8.bf16 %v111_v45  ;;  %v2458_v51 = vcombine.high %v214_v39, %v216_v42  ;;  %v219_v53 = vunpack.c.h.s8.bf16 %v110_v40 }
  0x56   :  { %1417 = vmatprep.subr.bf16.mxu0 %v2450_v30  ;;  %1589 = vmatprep.subr.bf16.mxu1 %v2452_v31  ;;  %v2460_v52 = vcombine.high %v215_v43, %v217_v44  ;;  %v221_v54 = vunpack.c.h.s8.bf16 %v111_v45  ;;  %v2457_v57 = vcombine.low %v214_v39, %v216_v42  ;;  %v2459_v58 = vcombine.low %v215_v43, %v217_v44  ;;  %v120_v31 = vld [vmem:[#allocation5 + $0xa0] sm:$0xff]  ;;  %v123_v42 = vld [vmem:[#allocation5 + $0xb8] sm:$0xff] }
  0x57   :  { %v2462_v59 = vcombine.high %v218_v49, %v220_v50  ;;  %v222_v60 = vunpack.c.l.s8.bf16 %v112_v55  ;;  %v224_v62 = vunpack.c.l.s8.bf16 %v113_v56  ;;  %v223_v63 = vunpack.c.h.s8.bf16 %v112_v55 }
  0x58   :  { %v2464_v61 = vcombine.high %v219_v53, %v221_v54  ;;  %v225_v0 = vunpack.c.h.s8.bf16 %v113_v56  ;;  %v2461_v3 = vcombine.low %v218_v49, %v220_v50  ;;  %v2463_v4 = vcombine.low %v219_v53, %v221_v54 }
  0x59   :  { %1418 = vmatpush1.bf16.msra.mxu0 %v2449_v36  ;;  %1590 = vmatpush1.bf16.msra.mxu1 %v2451_v37  ;;  %v226_v5 = vunpack.c.l.s8.bf16 %v114_v1  ;;  %v228_v6 = vunpack.c.l.s8.bf16 %v115_v2  ;;  %v2466_v7 = vcombine.high %v222_v60, %v224_v62  ;;  %v227_v9 = vunpack.c.h.s8.bf16 %v114_v1 }
  0x5a   :  { %1419 = vmatprep.subr.bf16.mxu0 %v2454_v38  ;;  %1591 = vmatprep.subr.bf16.mxu1 %v2456_v41  ;;  %v2468_v8 = vcombine.high %v223_v63, %v225_v0  ;;  %v229_v10 = vunpack.c.h.s8.bf16 %v115_v2  ;;  %v2465_v13 = vcombine.low %v222_v60, %v224_v62  ;;  %v2467_v14 = vcombine.low %v223_v63, %v225_v0  ;;  %v122_v41 = vld [vmem:[#allocation5 + $0xb0] sm:$0xff]  ;;  %v127_v62 = vld [vmem:[#allocation5 + $0xd8] sm:$0xff] }
  0x5b   :  { %v2470_v15 = vcombine.high %v226_v5, %v228_v6  ;;  %v230_v16 = vunpack.c.l.s8.bf16 %v116_v11  ;;  %v232_v18 = vunpack.c.l.s8.bf16 %v117_v12  ;;  %v231_v19 = vunpack.c.h.s8.bf16 %v116_v11 }
  0x5c   :  { %v2472_v17 = vcombine.high %v227_v9, %v229_v10  ;;  %v233_v20 = vunpack.c.h.s8.bf16 %v117_v12  ;;  %v2469_v23 = vcombine.low %v226_v5, %v228_v6  ;;  %v2471_v24 = vcombine.low %v227_v9, %v229_v10 }
  0x5d   :  { %1420 = vmatpush1.bf16.msra.mxu0 %v2453_v47  ;;  %1592 = vmatpush1.bf16.msra.mxu1 %v2455_v48  ;;  %v234_v25 = vunpack.c.l.s8.bf16 %v118_v21  ;;  %v236_v26 = vunpack.c.l.s8.bf16 %v119_v22  ;;  %v2474_v27 = vcombine.high %v230_v16, %v232_v18  ;;  %v235_v29 = vunpack.c.h.s8.bf16 %v118_v21 }
  0x5e   :  { %1421 = vmatprep.subr.bf16.mxu0 %v2458_v51  ;;  %1593 = vmatprep.subr.bf16.mxu1 %v2460_v52  ;;  %v2476_v28 = vcombine.high %v231_v19, %v233_v20  ;;  %v237_v30 = vunpack.c.h.s8.bf16 %v119_v22  ;;  %v2473_v33 = vcombine.low %v230_v16, %v232_v18  ;;  %v2475_v34 = vcombine.low %v231_v19, %v233_v20  ;;  %v124_v51 = vld [vmem:[#allocation5 + $0xc0] sm:$0xff]  ;;  %v125_v52 = vld [vmem:[#allocation5 + $0xc8] sm:$0xff]  ;;  %v131_v18 = vld [vmem:[#allocation5 + $0xf8] sm:$0xff] }
  0x5f   :  { %v2478_v35 = vcombine.high %v234_v25, %v236_v26  ;;  %v238_v36 = vunpack.c.l.s8.bf16 %v120_v31  ;;  %v240_v38 = vunpack.c.l.s8.bf16 %v121_v32  ;;  %v239_v39 = vunpack.c.h.s8.bf16 %v120_v31 }
  0x60   :  { %v2480_v37 = vcombine.high %v235_v29, %v237_v30  ;;  %v241_v40 = vunpack.c.h.s8.bf16 %v121_v32  ;;  %v2477_v43 = vcombine.low %v234_v25, %v236_v26  ;;  %v2479_v44 = vcombine.low %v235_v29, %v237_v30 }
  0x61   :  { %1422 = vmatpush1.bf16.msra.mxu0 %v2457_v57  ;;  %1594 = vmatpush1.bf16.msra.mxu1 %v2459_v58  ;;  %v242_v45 = vunpack.c.l.s8.bf16 %v122_v41  ;;  %v244_v46 = vunpack.c.l.s8.bf16 %v123_v42  ;;  %v2482_v47 = vcombine.high %v238_v36, %v240_v38  ;;  %v243_v49 = vunpack.c.h.s8.bf16 %v122_v41 }
  0x62   :  { %1423 = vmatprep.subr.bf16.mxu0 %v2462_v59  ;;  %1595 = vmatprep.subr.bf16.mxu1 %v2464_v61  ;;  %v2484_v48 = vcombine.high %v239_v39, %v241_v40  ;;  %v245_v50 = vunpack.c.h.s8.bf16 %v123_v42  ;;  %v2481_v53 = vcombine.low %v238_v36, %v240_v38  ;;  %v2483_v54 = vcombine.low %v239_v39, %v241_v40  ;;  %v126_v61 = vld [vmem:[#allocation5 + $0xd0] sm:$0xff]  ;;  %v135_v38 = vld [vmem:[#allocation5 + $0x118] sm:$0xff] }
  0x63   :  { %v2486_v55 = vcombine.high %v242_v45, %v244_v46  ;;  %v246_v56 = vunpack.c.l.s8.bf16 %v124_v51  ;;  %v248_v58 = vunpack.c.l.s8.bf16 %v125_v52  ;;  %v247_v59 = vunpack.c.h.s8.bf16 %v124_v51 }
  0x64   :  { %v2488_v57 = vcombine.high %v243_v49, %v245_v50  ;;  %v249_v60 = vunpack.c.h.s8.bf16 %v125_v52  ;;  %v2485_v63 = vcombine.low %v242_v45, %v244_v46  ;;  %v2487_v0 = vcombine.low %v243_v49, %v245_v50  ;;  %v2729_v49 = vld [vmem:[#allocation2] ss:$28 sps:$4 sm:$0xff]  }
  0x65   :  { %1424 = vmatpush1.bf16.msra.mxu0 %v2461_v3  ;;  %1596 = vmatpush1.bf16.msra.mxu1 %v2463_v4  ;;  %v250_v1 = vunpack.c.l.s8.bf16 %v126_v61  ;;  %v252_v2 = vunpack.c.l.s8.bf16 %v127_v62  ;;  %v2490_v3 = vcombine.high %v246_v56, %v248_v58  ;;  %v251_v5 = vunpack.c.h.s8.bf16 %v126_v61 }
  0x66   :  { %1425 = vmatprep.subr.bf16.mxu0 %v2466_v7  ;;  %1597 = vmatprep.subr.bf16.mxu1 %v2468_v8  ;;  %v2492_v4 = vcombine.high %v247_v59, %v249_v60  ;;  %v253_v6 = vunpack.c.h.s8.bf16 %v127_v62  ;;  %v128_v7 = vld [vmem:[#allocation5 + $0xe0] sm:$0xff]  ;;  %v129_v8 = vld [vmem:[#allocation5 + $0xe8] sm:$0xff]  ;;  %v2489_v9 = vcombine.low %v246_v56, %v248_v58  ;;  %v2491_v10 = vcombine.low %v247_v59, %v249_v60  ;;  %v138_v58 = vld [vmem:[#allocation5 + $0x130] sm:$0xff] }
  0x67   :  { %v2494_v11 = vcombine.high %v250_v1, %v252_v2  ;;  %v254_v12 = vunpack.c.l.s8.bf16 %v128_v7  ;;  %v257_v16 = vunpack.c.h.s8.bf16 %v129_v8  ;;  %v2493_v19 = vcombine.low %v250_v1, %v252_v2  ;;  %v139_v59 = vld [vmem:[#allocation5 + $0x138] sm:$0xff]  ;;  %v2734_v60 = vld [vmem:[#allocation2 + $0xc] ss:$28 sps:$4 sm:$0xff]  }
  0x68   :  { %v2495_v20 = vcombine.low %v251_v5, %v253_v6  ;;  %v260_v22 = vunpack.c.l.s8.bf16 %v131_v18  ;;  %v261_v26 = vunpack.c.h.s8.bf16 %v131_v18  ;;  %v268_v42 = vunpack.c.l.s8.bf16 %v135_v38 }
  0x69   :  { %1426 = vmatpush1.bf16.msra.mxu0 %v2465_v13  ;;  %1598 = vmatpush1.bf16.msra.mxu1 %v2467_v14  ;;  %v2496_v13 = vcombine.high %v251_v5, %v253_v6  ;;  %v256_v14 = vunpack.c.l.s8.bf16 %v129_v8  ;;  %v269_v46 = vunpack.c.h.s8.bf16 %v135_v38  ;;  %v140_v5 = vld [vmem:[#allocation5 + $0x140] sm:$0xff]  ;;  %v141_v6 = vld [vmem:[#allocation5 + $0x148] sm:$0xff] }
  0x6a   :  { %1427 = vmatprep.subr.bf16.mxu0 %v2470_v15  ;;  %1599 = vmatprep.subr.bf16.mxu1 %v2472_v17  ;;  %v255_v15 = vunpack.c.h.s8.bf16 %v128_v7  ;;  %v130_v17 = vld [vmem:[#allocation5 + $0xf0] sm:$0xff] }
  0x6b   :  { %v258_v21 = vunpack.c.l.s8.bf16 %v130_v17  ;;  %v259_v25 = vunpack.c.h.s8.bf16 %v130_v17  ;;  %v2497_v29 = vcombine.low %v254_v12, %v256_v14 }
  0x6c   :  { %v2499_v30 = vcombine.low %v255_v15, %v257_v16 }
  0x6d   :  { %1428 = vmatpush1.bf16.msra.mxu0 %v2469_v23  ;;  %1600 = vmatpush1.bf16.msra.mxu1 %v2471_v24  ;;  %v2498_v23 = vcombine.high %v254_v12, %v256_v14  ;;  %v2500_v24 = vcombine.high %v255_v15, %v257_v16  ;;  %v2502_v31 = vcombine.high %v258_v21, %v260_v22  ;;  %v280_v12 = vunpack.c.l.s8.bf16 %v141_v6  ;;  %v142_v15 = vld [vmem:[#allocation5 + $0x150] sm:$0xff]  ;;  %v143_v16 = vld [vmem:[#allocation5 + $0x158] sm:$0xff] }
  0x6e   :  { %1429 = vmatprep.subr.bf16.mxu0 %v2474_v27  ;;  %1601 = vmatprep.subr.bf16.mxu1 %v2476_v28  ;;  %v132_v27 = vld [vmem:[#allocation5 + $0x100] sm:$0xff]  ;;  %v133_v28 = vld [vmem:[#allocation5 + $0x108] sm:$0xff]  ;;  %v2501_v39 = vcombine.low %v258_v21, %v260_v22  ;;  %v2503_v40 = vcombine.low %v259_v25, %v261_v26  ;;  %v281_v14 = vunpack.c.h.s8.bf16 %v141_v6 }
  0x6f   :  { %v262_v32 = vunpack.c.l.s8.bf16 %v132_v27  ;;  %v265_v36 = vunpack.c.h.s8.bf16 %v133_v28 }
  0x71   :  { %1430 = vmatpush1.bf16.msra.mxu0 %v2473_v33  ;;  %1602 = vmatpush1.bf16.msra.mxu1 %v2475_v34  ;;  %v2504_v33 = vcombine.high %v259_v25, %v261_v26  ;;  %v264_v34 = vunpack.c.l.s8.bf16 %v133_v28  ;;  %v144_v25 = vld [vmem:[#allocation5 + $0x160] sm:$0xff]  ;;  %v145_v26 = vld [vmem:[#allocation5 + $0x168] sm:$0xff] }
  0x72   :  { %1431 = vmatprep.subr.bf16.mxu0 %v2478_v35  ;;  %1603 = vmatprep.subr.bf16.mxu1 %v2480_v37  ;;  %v263_v35 = vunpack.c.h.s8.bf16 %v132_v27  ;;  %v134_v37 = vld [vmem:[#allocation5 + $0x110] sm:$0xff] }
  0x73   :  { %v266_v41 = vunpack.c.l.s8.bf16 %v134_v37  ;;  %v267_v45 = vunpack.c.h.s8.bf16 %v134_v37  ;;  %v2505_v50 = vcombine.low %v262_v32, %v264_v34 }
  0x74   :  { %v2507_v51 = vcombine.low %v263_v35, %v265_v36 }
  0x75   :  { %1432 = vmatpush1.bf16.msra.mxu0 %v2477_v43  ;;  %1604 = vmatpush1.bf16.msra.mxu1 %v2479_v44  ;;  %v2506_v43 = vcombine.high %v262_v32, %v264_v34  ;;  %v2508_v44 = vcombine.high %v263_v35, %v265_v36  ;;  %v2510_v52 = vcombine.high %v266_v41, %v268_v42  ;;  %v288_v32 = vunpack.c.l.s8.bf16 %v145_v26  ;;  %v146_v35 = vld [vmem:[#allocation5 + $0x170] sm:$0xff]  ;;  %v147_v36 = vld [vmem:[#allocation5 + $0x178] sm:$0xff] }
  0x76   :  { %1433 = vmatprep.subr.bf16.mxu0 %v2482_v47  ;;  %1605 = vmatprep.subr.bf16.mxu1 %v2484_v48  ;;  %v136_v47 = vld [vmem:[#allocation5 + $0x120] sm:$0xff]  ;;  %v137_v48 = vld [vmem:[#allocation5 + $0x128] sm:$0xff]  ;;  %v2509_v61 = vcombine.low %v266_v41, %v268_v42  ;;  %v2511_v62 = vcombine.low %v267_v45, %v269_v46  ;;  %v289_v34 = vunpack.c.h.s8.bf16 %v145_v26 }
  0x77   :  { %v271_v56 = vunpack.c.h.s8.bf16 %v136_v47 }
  0x79   :  { %1434 = vmatpush1.bf16.msra.mxu0 %v2481_v53  ;;  %1606 = vmatpush1.bf16.msra.mxu1 %v2483_v54  ;;  %v270_v53 = vunpack.c.l.s8.bf16 %v136_v47  ;;  %v2512_v54 = vcombine.high %v267_v45, %v269_v46  ;;  %v148_v45 = vld [vmem:[#allocation5 + $0x180] sm:$0xff]  ;;  %v149_v46 = vld [vmem:[#allocation5 + $0x188] sm:$0xff] }
  0x7a   :  { %1435 = vmatprep.subr.bf16.mxu0 %v2486_v55  ;;  %1607 = vmatprep.subr.bf16.mxu1 %v2488_v57  ;;  %v272_v55 = vunpack.c.l.s8.bf16 %v137_v48  ;;  %v273_v57 = vunpack.c.h.s8.bf16 %v137_v48 }
  0x7c   :  { %v2514_v1 = vcombine.high %v270_v53, %v272_v55  ;;  %v2516_v2 = vcombine.high %v271_v56, %v273_v57  ;;  %v2513_v7 = vcombine.low %v270_v53, %v272_v55  ;;  %v2515_v8 = vcombine.low %v271_v56, %v273_v57  ;;  %v150_v55 = vld [vmem:[#allocation5 + $0x190] sm:$0xff]  ;;  %v151_v56 = vld [vmem:[#allocation5 + $0x198] sm:$0xff] }
  0x7d   :  { %1436 = vmatpush1.bf16.msra.mxu0 %v2485_v63  ;;  %1608 = vmatpush1.bf16.msra.mxu1 %v2487_v0  ;;  %v274_v63 = vunpack.c.l.s8.bf16 %v138_v58  ;;  %v276_v0 = vunpack.c.l.s8.bf16 %v139_v59  ;;  %v295_v53 = vunpack.c.h.s8.bf16 %v148_v45 }
  0x7e   :  { %1437 = vmatprep.subr.bf16.mxu0 %v2490_v3  ;;  %1609 = vmatprep.subr.bf16.mxu1 %v2492_v4  ;;  %v275_v3 = vunpack.c.h.s8.bf16 %v138_v58  ;;  %v277_v4 = vunpack.c.h.s8.bf16 %v139_v59  ;;  %v298_v59 = vunpack.c.l.s8.bf16 %v150_v55 }
  0x7f   :  { %v2517_v17 = vcombine.low %v274_v63, %v276_v0 }
  0x80   :  { %v2519_v18 = vcombine.low %v275_v3, %v277_v4 }
  0x81   :  { %1438 = vmatpush1.bf16.msra.mxu0 %v2489_v9  ;;  %1610 = vmatpush1.bf16.msra.mxu1 %v2491_v10  ;;  %v2518_v9 = vcombine.high %v274_v63, %v276_v0  ;;  %v278_v10 = vunpack.c.l.s8.bf16 %v140_v5  ;;  %v299_v63 = vunpack.c.h.s8.bf16 %v150_v55  ;;  %v301_v0 = vunpack.c.h.s8.bf16 %v151_v56 }
  0x82   :  { %1439 = vmatprep.subr.bf16.mxu0 %v2494_v11  ;;  %1611 = vmatprep.subr.bf16.mxu1 %v2496_v13  ;;  %v2520_v11 = vcombine.high %v275_v3, %v277_v4  ;;  %v279_v13 = vunpack.c.h.s8.bf16 %v140_v5 }
  0x83   :  { %v2522_v21 = vcombine.high %v278_v10, %v280_v12  ;;  %v2521_v27 = vcombine.low %v278_v10, %v280_v12  ;;  %v155_v12 = vld [vmem:[#allocation5 + $0x1b8] sm:$0xff] }
  0x84   :  { %v2524_v22 = vcombine.high %v279_v13, %v281_v14  ;;  %v2523_v28 = vcombine.low %v279_v13, %v281_v14  ;;  %v2543_v14 = vcombine.low %v299_v63, %v301_v0 }
  0x85   :  { %1440 = vmatpush1.bf16.msra.mxu0 %v2493_v19  ;;  %1612 = vmatpush1.bf16.msra.mxu1 %v2495_v20  ;;  %v282_v19 = vunpack.c.l.s8.bf16 %v142_v15  ;;  %v284_v20 = vunpack.c.l.s8.bf16 %v143_v16 }
  0x86   :  { %1441 = vmatprep.subr.bf16.mxu0 %v2498_v23  ;;  %1613 = vmatprep.subr.bf16.mxu1 %v2500_v24  ;;  %v283_v23 = vunpack.c.h.s8.bf16 %v142_v15  ;;  %v285_v24 = vunpack.c.h.s8.bf16 %v143_v16  ;;  %v308_v16 = vunpack.c.l.s8.bf16 %v155_v12 }
  0x87   :  { %v2525_v37 = vcombine.low %v282_v19, %v284_v20 }
  0x88   :  { %v2527_v38 = vcombine.low %v283_v23, %v285_v24 }
  0x89   :  { %1442 = vmatpush1.bf16.msra.mxu0 %v2497_v29  ;;  %1614 = vmatpush1.bf16.msra.mxu1 %v2499_v30  ;;  %v2526_v29 = vcombine.high %v282_v19, %v284_v20  ;;  %v286_v30 = vunpack.c.l.s8.bf16 %v144_v25  ;;  %v309_v20 = vunpack.c.h.s8.bf16 %v155_v12 }
  0x8a   :  { %1443 = vmatprep.subr.bf16.mxu0 %v2502_v31  ;;  %1615 = vmatprep.subr.bf16.mxu1 %v2504_v33  ;;  %v2528_v31 = vcombine.high %v283_v23, %v285_v24  ;;  %v287_v33 = vunpack.c.h.s8.bf16 %v144_v25 }
  0x8b   :  { %v2530_v41 = vcombine.high %v286_v30, %v288_v32  ;;  %v2529_v47 = vcombine.low %v286_v30, %v288_v32  ;;  %v159_v32 = vld [vmem:[#allocation5 + $0x1d8] sm:$0xff] }
  0x8c   :  { %v2532_v42 = vcombine.high %v287_v33, %v289_v34  ;;  %v2531_v48 = vcombine.low %v287_v33, %v289_v34 }
  0x8d   :  { %1444 = vmatpush1.bf16.msra.mxu0 %v2501_v39  ;;  %1616 = vmatpush1.bf16.msra.mxu1 %v2503_v40  ;;  %v290_v39 = vunpack.c.l.s8.bf16 %v146_v35  ;;  %v292_v40 = vunpack.c.l.s8.bf16 %v147_v36 }
  0x8e   :  { %1456 = vmatprep.subr.bf16.mxu0 %v2506_v43  ;;  %1628 = vmatprep.subr.bf16.mxu1 %v2508_v44  ;;  %v291_v43 = vunpack.c.h.s8.bf16 %v146_v35  ;;  %v293_v44 = vunpack.c.h.s8.bf16 %v147_v36  ;;  %v316_v36 = vunpack.c.l.s8.bf16 %v159_v32 }
  0x8f   :  { %v2533_v57 = vcombine.low %v290_v39, %v292_v40 }
  0x90   :  { %1446 = vmatmul.mubr.bf16.vlgmr.msra.gmra.mrb[0].mxu0 %v2729_v49  ;;  %1618 = vmatmul.mubr.bf16.vlgmr.msra.gmra.mrb[0].mxu1 %v2729_v49  ;;  %v2534_v49 = vcombine.high %v290_v39, %v292_v40  ;;  %v2535_v58 = vcombine.low %v291_v43, %v293_v44  ;;  %v317_v40 = vunpack.c.h.s8.bf16 %v159_v32 }
  0x91   :  { %1457 = vmatpush1.bf16.msra.mxu0 %v2505_v50  ;;  %1629 = vmatpush1.bf16.msra.mxu1 %v2507_v51  ;;  %v294_v50 = vunpack.c.l.s8.bf16 %v148_v45  ;;  %v2536_v51 = vcombine.high %v291_v43, %v293_v44 }
  0x92   :  { %1458 = vmatprep.subr.bf16.mxu0 %v2510_v52  ;;  %1630 = vmatprep.subr.bf16.mxu1 %v2512_v54  ;;  %v296_v52 = vunpack.c.l.s8.bf16 %v149_v46  ;;  %v297_v54 = vunpack.c.h.s8.bf16 %v149_v46 }
  0x93   :  { %1488 = vmatprep.mubr.bf16.mxu0 %v2734_v60  ;;  %1660 = vmatprep.mubr.bf16.mxu1 %v2734_v60  ;;  %v300_v60 = vunpack.c.l.s8.bf16 %v151_v56 }
  0x94   :  { %v2537_v3 = vcombine.low %v294_v50, %v296_v52  ;;  %v2539_v4 = vcombine.low %v295_v53, %v297_v54 }
  0x95   :  { %1459 = vmatpush1.bf16.msra.mxu0 %v2509_v61  ;;  %1631 = vmatpush1.bf16.msra.mxu1 %v2511_v62  ;;  %v2538_v61 = vcombine.high %v294_v50, %v296_v52  ;;  %v2540_v62 = vcombine.high %v295_v53, %v297_v54  ;;  %v2542_v5 = vcombine.high %v298_v59, %v300_v60  ;;  %v163_v52 = vld [vmem:[#allocation5 + $0x1f8] sm:$0xff] }
  0x96   :  { %1460 = vmatprep.subr.bf16.mxu0 %v2514_v1  ;;  %1632 = vmatprep.subr.bf16.mxu1 %v2516_v2  ;;  %v152_v1 = vld [vmem:[#allocation5 + $0x1a0] sm:$0xff]  ;;  %v153_v2 = vld [vmem:[#allocation5 + $0x1a8] sm:$0xff]  ;;  %v2541_v13 = vcombine.low %v298_v59, %v300_v60  ;;  %v324_v56 = vunpack.c.l.s8.bf16 %v163_v52  ;;  %v325_v60 = vunpack.c.h.s8.bf16 %v163_v52 }
  0x97   :  { %v302_v6 = vunpack.c.l.s8.bf16 %v152_v1  ;;  %v305_v10 = vunpack.c.h.s8.bf16 %v153_v2 }
  0x99   :  { %1461 = vmatpush1.bf16.msra.mxu0 %v2513_v7  ;;  %1633 = vmatpush1.bf16.msra.mxu1 %v2515_v8  ;;  %v2544_v7 = vcombine.high %v299_v63, %v301_v0  ;;  %v304_v8 = vunpack.c.l.s8.bf16 %v153_v2 }
  0x9a   :  { %1462 = vmatprep.subr.bf16.mxu0 %v2518_v9  ;;  %1634 = vmatprep.subr.bf16.mxu1 %v2520_v11  ;;  %v303_v9 = vunpack.c.h.s8.bf16 %v152_v1  ;;  %v154_v11 = vld [vmem:[#allocation5 + $0x1b0] sm:$0xff] }
  0x9b   :  { %v306_v15 = vunpack.c.l.s8.bf16 %v154_v11  ;;  %v307_v19 = vunpack.c.h.s8.bf16 %v154_v11  ;;  %v2545_v23 = vcombine.low %v302_v6, %v304_v8 }
  0x9c   :  { %v2547_v24 = vcombine.low %v303_v9, %v305_v10 }
  0x9d   :  { %1463 = vmatpush1.bf16.msra.mxu0 %v2517_v17  ;;  %1635 = vmatpush1.bf16.msra.mxu1 %v2519_v18  ;;  %v2546_v17 = vcombine.high %v302_v6, %v304_v8  ;;  %v2548_v18 = vcombine.high %v303_v9, %v305_v10  ;;  %v2550_v25 = vcombine.high %v306_v15, %v308_v16  ;;  %v167_v8 = vld [vmem:[#allocation5 + $0x218] sm:$0xff] }
  0x9e   :  { %1464 = vmatprep.subr.bf16.mxu0 %v2522_v21  ;;  %1636 = vmatprep.subr.bf16.mxu1 %v2524_v22  ;;  %v156_v21 = vld [vmem:[#allocation5 + $0x1c0] sm:$0xff]  ;;  %v157_v22 = vld [vmem:[#allocation5 + $0x1c8] sm:$0xff]  ;;  %v2549_v33 = vcombine.low %v306_v15, %v308_v16  ;;  %v2551_v34 = vcombine.low %v307_v19, %v309_v20  ;;  %v332_v12 = vunpack.c.l.s8.bf16 %v167_v8  ;;  %v333_v16 = vunpack.c.h.s8.bf16 %v167_v8 }
  0x9f   :  { %v310_v26 = vunpack.c.l.s8.bf16 %v156_v21  ;;  %v313_v30 = vunpack.c.h.s8.bf16 %v157_v22 }
  0xa1   :  { %1465 = vmatpush1.bf16.msra.mxu0 %v2521_v27  ;;  %1637 = vmatpush1.bf16.msra.mxu1 %v2523_v28  ;;  %v2552_v27 = vcombine.high %v307_v19, %v309_v20  ;;  %v312_v28 = vunpack.c.l.s8.bf16 %v157_v22  ;;  %v2732_v19 = vld [vmem:[#allocation2 + $0x8] ss:$28 sps:$4 sm:$0xff]  }
  0xa2   :  { %1466 = vmatprep.subr.bf16.mxu0 %v2526_v29  ;;  %1638 = vmatprep.subr.bf16.mxu1 %v2528_v31  ;;  %v311_v29 = vunpack.c.h.s8.bf16 %v156_v21  ;;  %v158_v31 = vld [vmem:[#allocation5 + $0x1d0] sm:$0xff] }
  0xa3   :  { %v314_v35 = vunpack.c.l.s8.bf16 %v158_v31  ;;  %v315_v39 = vunpack.c.h.s8.bf16 %v158_v31  ;;  %v2553_v43 = vcombine.low %v310_v26, %v312_v28 }
  0xa4   :  { %v2555_v44 = vcombine.low %v311_v29, %v313_v30 }
  0xa5   :  { %1467 = vmatpush1.bf16.msra.mxu0 %v2525_v37  ;;  %1639 = vmatpush1.bf16.msra.mxu1 %v2527_v38  ;;  %v2554_v37 = vcombine.high %v310_v26, %v312_v28  ;;  %v2556_v38 = vcombine.high %v311_v29, %v313_v30  ;;  %v2558_v45 = vcombine.high %v314_v35, %v316_v36  ;;  %v170_v28 = vld [vmem:[#allocation5 + $0x230] sm:$0xff]  ;;  %v171_v29 = vld [vmem:[#allocation5 + $0x238] sm:$0xff] }
  0xa6   :  { %1468 = vmatprep.subr.bf16.mxu0 %v2530_v41  ;;  %1640 = vmatprep.subr.bf16.mxu1 %v2532_v42  ;;  %v160_v41 = vld [vmem:[#allocation5 + $0x1e0] sm:$0xff]  ;;  %v161_v42 = vld [vmem:[#allocation5 + $0x1e8] sm:$0xff]  ;;  %v2557_v53 = vcombine.low %v314_v35, %v316_v36  ;;  %v2559_v54 = vcombine.low %v315_v39, %v317_v40  ;;  %v2737_v30 = vld [vmem:[#allocation2 + $0x14] ss:$28 sps:$4 sm:$0xff]  }
  0xa7   :  { %v318_v46 = vunpack.c.l.s8.bf16 %v160_v41  ;;  %v321_v50 = vunpack.c.h.s8.bf16 %v161_v42 }
  0xa9   :  { %1469 = vmatpush1.bf16.msra.mxu0 %v2529_v47  ;;  %1641 = vmatpush1.bf16.msra.mxu1 %v2531_v48  ;;  %v2560_v47 = vcombine.high %v315_v39, %v317_v40  ;;  %v320_v48 = vunpack.c.l.s8.bf16 %v161_v42  ;;  %v172_v39 = vld [vmem:[#allocation5 + $0x240] sm:$0xff]  ;;  %v173_v40 = vld [vmem:[#allocation5 + $0x248] sm:$0xff] }
  0xaa   :  { %1470 = vmatprep.subr.bf16.mxu0 %v2534_v49  ;;  %1642 = vmatprep.subr.bf16.mxu1 %v2536_v51  ;;  %v319_v49 = vunpack.c.h.s8.bf16 %v160_v41  ;;  %v162_v51 = vld [vmem:[#allocation5 + $0x1f0] sm:$0xff] }
  0xab   :  { %v322_v55 = vunpack.c.l.s8.bf16 %v162_v51  ;;  %v323_v59 = vunpack.c.h.s8.bf16 %v162_v51  ;;  %v2561_v63 = vcombine.low %v318_v46, %v320_v48 }
  0xac   :  { %v2563_v0 = vcombine.low %v319_v49, %v321_v50 }
  0xad   :  { %1471 = vmatpush1.bf16.msra.mxu0 %v2533_v57  ;;  %1643 = vmatpush1.bf16.msra.mxu1 %v2535_v58  ;;  %v2562_v57 = vcombine.high %v318_v46, %v320_v48  ;;  %v2564_v58 = vcombine.high %v319_v49, %v321_v50  ;;  %v2566_v1 = vcombine.high %v322_v55, %v324_v56  ;;  %v344_v46 = vunpack.c.l.s8.bf16 %v173_v40  ;;  %v174_v49 = vld [vmem:[#allocation5 + $0x250] sm:$0xff]  ;;  %v175_v50 = vld [vmem:[#allocation5 + $0x258] sm:$0xff] }
  0xae   :  { %1472 = vmatprep.subr.bf16.mxu0 %v2538_v61  ;;  %1644 = vmatprep.subr.bf16.mxu1 %v2540_v62  ;;  %v164_v61 = vld [vmem:[#allocation5 + $0x200] sm:$0xff]  ;;  %v165_v62 = vld [vmem:[#allocation5 + $0x208] sm:$0xff]  ;;  %v2565_v9 = vcombine.low %v322_v55, %v324_v56  ;;  %v2567_v10 = vcombine.low %v323_v59, %v325_v60  ;;  %v345_v48 = vunpack.c.h.s8.bf16 %v173_v40 }
  0xaf   :  { %v326_v2 = vunpack.c.l.s8.bf16 %v164_v61  ;;  %v329_v6 = vunpack.c.h.s8.bf16 %v165_v62 }
  0xb1   :  { %1473 = vmatpush1.bf16.msra.mxu0 %v2537_v3  ;;  %1645 = vmatpush1.bf16.msra.mxu1 %v2539_v4  ;;  %v2568_v3 = vcombine.high %v323_v59, %v325_v60  ;;  %v328_v4 = vunpack.c.l.s8.bf16 %v165_v62  ;;  %v176_v59 = vld [vmem:[#allocation5 + $0x260] sm:$0xff]  ;;  %v177_v60 = vld [vmem:[#allocation5 + $0x268] sm:$0xff] }
  0xb2   :  { %1474 = vmatprep.subr.bf16.mxu0 %v2542_v5  ;;  %1646 = vmatprep.subr.bf16.mxu1 %v2544_v7  ;;  %v327_v5 = vunpack.c.h.s8.bf16 %v164_v61  ;;  %v166_v7 = vld [vmem:[#allocation5 + $0x210] sm:$0xff] }
  0xb3   :  { %v330_v11 = vunpack.c.l.s8.bf16 %v166_v7  ;;  %v331_v15 = vunpack.c.h.s8.bf16 %v166_v7  ;;  %v2569_v20 = vcombine.low %v326_v2, %v328_v4 }
  0xb4   :  { %v2571_v21 = vcombine.low %v327_v5, %v329_v6 }
  0xb5   :  { %1475 = vmatpush1.bf16.msra.mxu0 %v2541_v13  ;;  %1647 = vmatpush1.bf16.msra.mxu1 %v2543_v14  ;;  %v2570_v13 = vcombine.high %v326_v2, %v328_v4  ;;  %v2572_v14 = vcombine.high %v327_v5, %v329_v6  ;;  %v2574_v22 = vcombine.high %v330_v11, %v332_v12  ;;  %v352_v2 = vunpack.c.l.s8.bf16 %v177_v60  ;;  %v178_v5 = vld [vmem:[#allocation5 + $0x270] sm:$0xff]  ;;  %v179_v6 = vld [vmem:[#allocation5 + $0x278] sm:$0xff] }
  0xb6   :  { %1476 = vmatprep.subr.bf16.mxu0 %v2546_v17  ;;  %1648 = vmatprep.subr.bf16.mxu1 %v2548_v18  ;;  %v168_v17 = vld [vmem:[#allocation5 + $0x220] sm:$0xff]  ;;  %v169_v18 = vld [vmem:[#allocation5 + $0x228] sm:$0xff]  ;;  %v2573_v31 = vcombine.low %v330_v11, %v332_v12  ;;  %v2575_v32 = vcombine.low %v331_v15, %v333_v16  ;;  %v353_v4 = vunpack.c.h.s8.bf16 %v177_v60 }
  0xb7   :  { %v335_v26 = vunpack.c.h.s8.bf16 %v168_v17 }
  0xb9   :  { %1477 = vmatpush1.bf16.msra.mxu0 %v2545_v23  ;;  %1649 = vmatpush1.bf16.msra.mxu1 %v2547_v24  ;;  %v334_v23 = vunpack.c.l.s8.bf16 %v168_v17  ;;  %v2576_v24 = vcombine.high %v331_v15, %v333_v16  ;;  %v180_v15 = vld [vmem:[#allocation5 + $0x280] sm:$0xff]  ;;  %v181_v16 = vld [vmem:[#allocation5 + $0x288] sm:$0xff] }
  0xba   :  { %1478 = vmatprep.subr.bf16.mxu0 %v2550_v25  ;;  %1650 = vmatprep.subr.bf16.mxu1 %v2552_v27  ;;  %v336_v25 = vunpack.c.l.s8.bf16 %v169_v18  ;;  %v337_v27 = vunpack.c.h.s8.bf16 %v169_v18 }
  0xbc   :  { %v2578_v35 = vcombine.high %v334_v23, %v336_v25  ;;  %v2580_v36 = vcombine.high %v335_v26, %v337_v27  ;;  %v2577_v41 = vcombine.low %v334_v23, %v336_v25  ;;  %v2579_v42 = vcombine.low %v335_v26, %v337_v27  ;;  %v182_v25 = vld [vmem:[#allocation5 + $0x290] sm:$0xff]  ;;  %v183_v26 = vld [vmem:[#allocation5 + $0x298] sm:$0xff] }
  0xbd   :  { %1479 = vmatpush1.bf16.msra.mxu0 %v2549_v33  ;;  %1651 = vmatpush1.bf16.msra.mxu1 %v2551_v34  ;;  %v338_v33 = vunpack.c.l.s8.bf16 %v170_v28  ;;  %v340_v34 = vunpack.c.l.s8.bf16 %v171_v29  ;;  %v359_v23 = vunpack.c.h.s8.bf16 %v180_v15 }
  0xbe   :  { %1480 = vmatprep.subr.bf16.mxu0 %v2554_v37  ;;  %1652 = vmatprep.subr.bf16.mxu1 %v2556_v38  ;;  %v339_v37 = vunpack.c.h.s8.bf16 %v170_v28  ;;  %v341_v38 = vunpack.c.h.s8.bf16 %v171_v29  ;;  %v362_v29 = vunpack.c.l.s8.bf16 %v182_v25 }
  0xbf   :  { %v2581_v51 = vcombine.low %v338_v33, %v340_v34 }
  0xc0   :  { %v2583_v52 = vcombine.low %v339_v37, %v341_v38 }
  0xc1   :  { %1481 = vmatpush1.bf16.msra.mxu0 %v2553_v43  ;;  %1653 = vmatpush1.bf16.msra.mxu1 %v2555_v44  ;;  %v2582_v43 = vcombine.high %v338_v33, %v340_v34  ;;  %v342_v44 = vunpack.c.l.s8.bf16 %v172_v39  ;;  %v363_v33 = vunpack.c.h.s8.bf16 %v182_v25  ;;  %v365_v34 = vunpack.c.h.s8.bf16 %v183_v26 }
  0xc2   :  { %1482 = vmatprep.subr.bf16.mxu0 %v2558_v45  ;;  %1654 = vmatprep.subr.bf16.mxu1 %v2560_v47  ;;  %v2584_v45 = vcombine.high %v339_v37, %v341_v38  ;;  %v343_v47 = vunpack.c.h.s8.bf16 %v172_v39 }
  0xc3   :  { %v2586_v55 = vcombine.high %v342_v44, %v344_v46  ;;  %v2585_v61 = vcombine.low %v342_v44, %v344_v46  ;;  %v187_v46 = vld [vmem:[#allocation5 + $0x2b8] sm:$0xff] }
  0xc4   :  { %v2588_v56 = vcombine.high %v343_v47, %v345_v48  ;;  %v2587_v62 = vcombine.low %v343_v47, %v345_v48  ;;  %v2607_v48 = vcombine.low %v363_v33, %v365_v34 }
  0xc5   :  { %1483 = vmatpush1.bf16.msra.mxu0 %v2557_v53  ;;  %1655 = vmatpush1.bf16.msra.mxu1 %v2559_v54  ;;  %v346_v53 = vunpack.c.l.s8.bf16 %v174_v49  ;;  %v348_v54 = vunpack.c.l.s8.bf16 %v175_v50 }
  0xc6   :  { %1484 = vmatprep.subr.bf16.mxu0 %v2562_v57  ;;  %1656 = vmatprep.subr.bf16.mxu1 %v2564_v58  ;;  %v347_v57 = vunpack.c.h.s8.bf16 %v174_v49  ;;  %v349_v58 = vunpack.c.h.s8.bf16 %v175_v50  ;;  %v372_v50 = vunpack.c.l.s8.bf16 %v187_v46 }
  0xc7   :  { %v2589_v7 = vcombine.low %v346_v53, %v348_v54 }
  0xc8   :  { %v2591_v8 = vcombine.low %v347_v57, %v349_v58 }
  0xc9   :  { %1485 = vmatpush1.bf16.msra.mxu0 %v2561_v63  ;;  %1657 = vmatpush1.bf16.msra.mxu1 %v2563_v0  ;;  %v2590_v63 = vcombine.high %v346_v53, %v348_v54  ;;  %v350_v0 = vunpack.c.l.s8.bf16 %v176_v59  ;;  %v373_v54 = vunpack.c.h.s8.bf16 %v187_v46  ;;  %v1830_v46 = vld [vmem:[#allocation7 + $0x8] sm:$0xff] }
  0xca   :  { %1486 = vmatprep.subr.bf16.mxu0 %v2566_v1  ;;  %1658 = vmatprep.subr.bf16.mxu1 %v2568_v3  ;;  %v2592_v1 = vcombine.high %v347_v57, %v349_v58  ;;  %v351_v3 = vunpack.c.h.s8.bf16 %v176_v59 }
  0xcb   :  { %v2594_v11 = vcombine.high %v350_v0, %v352_v2  ;;  %v2593_v17 = vcombine.low %v350_v0, %v352_v2  ;;  %v191_v2 = vld [vmem:[#allocation5 + $0x2d8] sm:$0xff] }
  0xcc   :  { %v2596_v12 = vcombine.high %v351_v3, %v353_v4  ;;  %v2595_v18 = vcombine.low %v351_v3, %v353_v4 }
  0xcd   :  { %1487 = vmatpush1.bf16.msra.mxu0 %v2565_v9  ;;  %1659 = vmatpush1.bf16.msra.mxu1 %v2567_v10  ;;  %v354_v9 = vunpack.c.l.s8.bf16 %v178_v5  ;;  %v356_v10 = vunpack.c.l.s8.bf16 %v179_v6 }
  0xce   :  { %1499 = vmatprep.subr.bf16.mxu0 %v2570_v13  ;;  %1671 = vmatprep.subr.bf16.mxu1 %v2572_v14  ;;  %v355_v13 = vunpack.c.h.s8.bf16 %v178_v5  ;;  %v357_v14 = vunpack.c.h.s8.bf16 %v179_v6  ;;  %v380_v6 = vunpack.c.l.s8.bf16 %v191_v2 }
  0xcf   :  { %v2597_v27 = vcombine.low %v354_v9, %v356_v10 }
  0xd0   :  { %1489 = vmatmul.mubr.bf16.vlgmr.msra.gmra.mrb[0].mxu0 %v2732_v19  ;;  %1661 = vmatmul.mubr.bf16.vlgmr.msra.gmra.mrb[0].mxu1 %v2732_v19  ;;  %v2598_v19 = vcombine.high %v354_v9, %v356_v10  ;;  %v2599_v28 = vcombine.low %v355_v13, %v357_v14  ;;  %v381_v10 = vunpack.c.h.s8.bf16 %v191_v2  ;;  %v1833_v2 = vld [vmem:[#allocation7 + $0x20] sm:$0xff] }
  0xd1   :  { %1500 = vmatpush1.bf16.msra.mxu0 %v2569_v20  ;;  %1672 = vmatpush1.bf16.msra.mxu1 %v2571_v21  ;;  %v358_v20 = vunpack.c.l.s8.bf16 %v180_v15  ;;  %v2600_v21 = vcombine.high %v355_v13, %v357_v14 }
  0xd2   :  { %1501 = vmatprep.subr.bf16.mxu0 %v2574_v22  ;;  %1673 = vmatprep.subr.bf16.mxu1 %v2576_v24  ;;  %v360_v22 = vunpack.c.l.s8.bf16 %v181_v16  ;;  %v361_v24 = vunpack.c.h.s8.bf16 %v181_v16 }
  0xd3   :  { %1531 = vmatprep.mubr.bf16.mxu0 %v2737_v30  ;;  %1703 = vmatprep.mubr.bf16.mxu1 %v2737_v30  ;;  %v364_v30 = vunpack.c.l.s8.bf16 %v183_v26 }
  0xd4   :  { %v2601_v37 = vcombine.low %v358_v20, %v360_v22  ;;  %v2603_v38 = vcombine.low %v359_v23, %v361_v24 }
  0xd5   :  { %1502 = vmatpush1.bf16.msra.mxu0 %v2573_v31  ;;  %1674 = vmatpush1.bf16.msra.mxu1 %v2575_v32  ;;  %v2602_v31 = vcombine.high %v358_v20, %v360_v22  ;;  %v2604_v32 = vcombine.high %v359_v23, %v361_v24  ;;  %v2606_v39 = vcombine.high %v362_v29, %v364_v30  ;;  %v195_v22 = vld [vmem:[#allocation5 + $0x2f8] sm:$0xff] }
  0xd6   :  { %1503 = vmatprep.subr.bf16.mxu0 %v2578_v35  ;;  %1675 = vmatprep.subr.bf16.mxu1 %v2580_v36  ;;  %v184_v35 = vld [vmem:[#allocation5 + $0x2a0] sm:$0xff]  ;;  %v185_v36 = vld [vmem:[#allocation5 + $0x2a8] sm:$0xff]  ;;  %v2605_v47 = vcombine.low %v362_v29, %v364_v30  ;;  %v388_v26 = vunpack.c.l.s8.bf16 %v195_v22  ;;  %v389_v30 = vunpack.c.h.s8.bf16 %v195_v22 }
  0xd7   :  { %v366_v40 = vunpack.c.l.s8.bf16 %v184_v35  ;;  %v369_v44 = vunpack.c.h.s8.bf16 %v185_v36 }
  0xd9   :  { %1504 = vmatpush1.bf16.msra.mxu0 %v2577_v41  ;;  %1676 = vmatpush1.bf16.msra.mxu1 %v2579_v42  ;;  %v2608_v41 = vcombine.high %v363_v33, %v365_v34  ;;  %v368_v42 = vunpack.c.l.s8.bf16 %v185_v36 }
  0xda   :  { %1505 = vmatprep.subr.bf16.mxu0 %v2582_v43  ;;  %1677 = vmatprep.subr.bf16.mxu1 %v2584_v45  ;;  %v367_v43 = vunpack.c.h.s8.bf16 %v184_v35  ;;  %v186_v45 = vld [vmem:[#allocation5 + $0x2b0] sm:$0xff] }
  0xdb   :  { %v370_v49 = vunpack.c.l.s8.bf16 %v186_v45  ;;  %v371_v53 = vunpack.c.h.s8.bf16 %v186_v45  ;;  %v2609_v57 = vcombine.low %v366_v40, %v368_v42  ;;  %v2735_v45 = vld [vmem:[#allocation2 + $0x10] ss:$28 sps:$4 sm:$0xff]  }
  0xdc   :  { %v2611_v58 = vcombine.low %v367_v43, %v369_v44 }
  0xdd   :  { %1506 = vmatpush1.bf16.msra.mxu0 %v2581_v51  ;;  %1678 = vmatpush1.bf16.msra.mxu1 %v2583_v52  ;;  %v2610_v51 = vcombine.high %v366_v40, %v368_v42  ;;  %v2612_v52 = vcombine.high %v367_v43, %v369_v44  ;;  %v2614_v59 = vcombine.high %v370_v49, %v372_v50 }
  0xde   :  { %1507 = vmatprep.subr.bf16.mxu0 %v2586_v55  ;;  %1679 = vmatprep.subr.bf16.mxu1 %v2588_v56  ;;  %v188_v55 = vld [vmem:[#allocation5 + $0x2c0] sm:$0xff]  ;;  %v189_v56 = vld [vmem:[#allocation5 + $0x2c8] sm:$0xff]  ;;  %v2613_v3 = vcombine.low %v370_v49, %v372_v50  ;;  %v2615_v4 = vcombine.low %v371_v53, %v373_v54  ;;  %v1894_v50 = vunpack.c.l.s8.bf16 %v1830_v46 }
  0xdf   :  { %v374_v60 = vunpack.c.l.s8.bf16 %v188_v55  ;;  %v377_v0 = vunpack.c.h.s8.bf16 %v189_v56 }
  0xe1   :  { %1508 = vmatpush1.bf16.msra.mxu0 %v2585_v61  ;;  %1680 = vmatpush1.bf16.msra.mxu1 %v2587_v62  ;;  %v2616_v61 = vcombine.high %v371_v53, %v373_v54  ;;  %v376_v62 = vunpack.c.l.s8.bf16 %v189_v56  ;;  %v1829_v53 = vld [vmem:[#allocation7] sm:$0xff]  ;;  %v1831_v54 = vld [vmem:[#allocation7 + $0x10] sm:$0xff] }
  0xe2   :  { %1509 = vmatprep.subr.bf16.mxu0 %v2590_v63  ;;  %1681 = vmatprep.subr.bf16.mxu1 %v2592_v1  ;;  %v375_v63 = vunpack.c.h.s8.bf16 %v188_v55  ;;  %v190_v1 = vld [vmem:[#allocation5 + $0x2d0] sm:$0xff]  ;;  %v2738_v55 = vld [vmem:[#allocation2 + $0x18] ss:$28 sps:$4 sm:$0xff]   ;;  %v1893_v56 = vunpack.c.l.s8.bf16 %v1829_v53 }
  0xe3   :  { %v378_v5 = vunpack.c.l.s8.bf16 %v190_v1  ;;  %v379_v9 = vunpack.c.h.s8.bf16 %v190_v1  ;;  %v2617_v13 = vcombine.low %v374_v60, %v376_v62 }
  0xe4   :  { %v2619_v14 = vcombine.low %v375_v63, %v377_v0 }
  0xe5   :  { %1510 = vmatpush1.bf16.msra.mxu0 %v2589_v7  ;;  %1682 = vmatpush1.bf16.msra.mxu1 %v2591_v8  ;;  %v2618_v7 = vcombine.high %v374_v60, %v376_v62  ;;  %v2620_v8 = vcombine.high %v375_v63, %v377_v0  ;;  %v2622_v15 = vcombine.high %v378_v5, %v380_v6  ;;  %v1834_v60 = vld [vmem:[#allocation7 + $0x28] sm:$0xff]  ;;  %v1897_v62 = vunpack.c.h.s8.bf16 %v1829_v53 }
  0xe6   :  { %1511 = vmatprep.subr.bf16.mxu0 %v2594_v11  ;;  %1683 = vmatprep.subr.bf16.mxu1 %v2596_v12  ;;  %v192_v11 = vld [vmem:[#allocation5 + $0x2e0] sm:$0xff]  ;;  %v193_v12 = vld [vmem:[#allocation5 + $0x2e8] sm:$0xff]  ;;  %v2621_v23 = vcombine.low %v378_v5, %v380_v6  ;;  %v2623_v24 = vcombine.low %v379_v9, %v381_v10  ;;  %v1899_v63 = vunpack.c.h.s8.bf16 %v1831_v54  ;;  %v1902_v0 = vunpack.c.l.s8.bf16 %v1834_v60 }
  0xe7   :  { %v382_v16 = vunpack.c.l.s8.bf16 %v192_v11  ;;  %v385_v20 = vunpack.c.h.s8.bf16 %v193_v12  ;;  %v1906_v6 = vunpack.c.h.s8.bf16 %v1834_v60 }
  0xe9   :  { %1512 = vmatpush1.bf16.msra.mxu0 %v2593_v17  ;;  %1684 = vmatpush1.bf16.msra.mxu1 %v2595_v18  ;;  %v2624_v17 = vcombine.high %v379_v9, %v381_v10  ;;  %v384_v18 = vunpack.c.l.s8.bf16 %v193_v12  ;;  %v1840_v9 = vld [vmem:[#allocation7 + $0x58] sm:$0xff]  ;;  %v1905_v10 = vunpack.c.h.s8.bf16 %v1833_v2 }
  0xea   :  { %1513 = vmatprep.subr.bf16.mxu0 %v2598_v19  ;;  %1685 = vmatprep.subr.bf16.mxu1 %v2600_v21  ;;  %v383_v19 = vunpack.c.h.s8.bf16 %v192_v11  ;;  %v194_v21 = vld [vmem:[#allocation5 + $0x2f0] sm:$0xff] }
  0xeb   :  { %v386_v25 = vunpack.c.l.s8.bf16 %v194_v21  ;;  %v387_v29 = vunpack.c.h.s8.bf16 %v194_v21  ;;  %v2625_v33 = vcombine.low %v382_v16, %v384_v18  ;;  %v1844_v21 = vld [vmem:[#allocation7 + $0x78] sm:$0xff] }
  0xec   :  { %v2627_v34 = vcombine.low %v383_v19, %v385_v20 }
  0xed   :  { %1514 = vmatpush1.bf16.msra.mxu0 %v2597_v27  ;;  %1686 = vmatpush1.bf16.msra.mxu1 %v2599_v28  ;;  %v2626_v27 = vcombine.high %v382_v16, %v384_v18  ;;  %v2628_v28 = vcombine.high %v383_v19, %v385_v20  ;;  %v2630_v35 = vcombine.high %v386_v25, %v388_v26  ;;  %v1916_v19 = vunpack.c.h.s8.bf16 %v1840_v9  ;;  %v1842_v20 = vld [vmem:[#allocation7 + $0x68] sm:$0xff] }
  0xee   :  { %1515 = vmatprep.subr.bf16.mxu0 %v2602_v31  ;;  %1687 = vmatprep.subr.bf16.mxu1 %v2604_v32  ;;  %v196_v31 = vld [vmem:[#allocation5 + $0x300] sm:$0xff]  ;;  %v197_v32 = vld [vmem:[#allocation5 + $0x308] sm:$0xff]  ;;  %v2631_v42 = vcombine.low %v387_v29, %v389_v30 }
  0xef   :  { %v390_v36 = vunpack.c.l.s8.bf16 %v196_v31  ;;  %v393_v40 = vunpack.c.h.s8.bf16 %v197_v32 }
  0xf1   :  { %1516 = vmatpush1.bf16.msra.mxu0 %v2601_v37  ;;  %1688 = vmatpush1.bf16.msra.mxu1 %v2603_v38  ;;  %v2632_v37 = vcombine.high %v387_v29, %v389_v30  ;;  %v392_v38 = vunpack.c.l.s8.bf16 %v197_v32  ;;  %v1922_v30 = vunpack.c.h.s8.bf16 %v1842_v20  ;;  %v1846_v32 = vld [vmem:[#allocation7 + $0x88] sm:$0xff] }
  0xf2   :  { %1517 = vmatprep.subr.bf16.mxu0 %v2606_v39  ;;  %1689 = vmatprep.subr.bf16.mxu1 %v2608_v41  ;;  %v391_v39 = vunpack.c.h.s8.bf16 %v196_v31  ;;  %v2629_v41 = vcombine.low %v386_v25, %v388_v26  ;;  %v1920_v25 = vunpack.c.l.s8.bf16 %v1844_v21  ;;  %v1841_v26 = vld [vmem:[#allocation7 + $0x60] sm:$0xff]  ;;  %v1924_v31 = vunpack.c.h.s8.bf16 %v1844_v21 }
  0xf3   :  { %v2634_v43 = vcombine.high %v390_v36, %v392_v38 }
  0xf4   :  { %v2636_v44 = vcombine.high %v391_v39, %v393_v40  ;;  %v2635_v49 = vcombine.low %v391_v39, %v393_v40  ;;  %v1847_v39 = vld [vmem:[#allocation7 + $0x90] sm:$0xff] }
  0xf5   :  { %1518 = vmatpush1.bf16.msra.mxu0 %v2605_v47  ;;  %1690 = vmatpush1.bf16.msra.mxu1 %v2607_v48  ;;  %v1832_v47 = vld [vmem:[#allocation7 + $0x18] sm:$0xff]  ;;  %v2633_v48 = vcombine.low %v390_v36, %v392_v38  ;;  %v1926_v36 = vunpack.c.l.s8.bf16 %v1846_v32  ;;  %v1845_v38 = vld [vmem:[#allocation7 + $0x80] sm:$0xff] }
  0xf6   :  { %1519 = vmatprep.subr.bf16.mxu0 %v2610_v51  ;;  %1691 = vmatprep.subr.bf16.mxu1 %v2612_v52  ;;  %v1896_v51 = vunpack.c.l.s8.bf16 %v1832_v47  ;;  %v2867_v52 = vmov 0   ;;  %v1925_v40 = vunpack.c.l.s8.bf16 %v1845_v38 }
  0xf9   :  { %1520 = vmatpush1.bf16.msra.mxu0 %v2609_v57  ;;  %1692 = vmatpush1.bf16.msra.mxu1 %v2611_v58  ;;  %v1895_v57 = vunpack.c.l.s8.bf16 %v1831_v54  ;;  %v1898_v58 = vunpack.c.h.s8.bf16 %v1830_v46  ;;  %v1929_v46 = vunpack.c.h.s8.bf16 %v1845_v38 }
  0xfa   :  { %1521 = vmatprep.subr.bf16.mxu0 %v2614_v59  ;;  %1693 = vmatprep.subr.bf16.mxu1 %v2616_v61  ;;  %v1900_v59 = vunpack.c.h.s8.bf16 %v1832_v47  ;;  %v1836_v61 = vld [vmem:[#allocation7 + $0x38] sm:$0xff]  ;;  %v1931_v47 = vunpack.c.h.s8.bf16 %v1847_v39 }
  0xfb   :  { %v1904_v1 = vunpack.c.l.s8.bf16 %v1836_v61 }
  0xfd   :  { %1522 = vmatpush1.bf16.msra.mxu0 %v2613_v3  ;;  %1694 = vmatpush1.bf16.msra.mxu1 %v2615_v4  ;;  %v1835_v3 = vld [vmem:[#allocation7 + $0x30] sm:$0xff]  ;;  %v1901_v4 = vunpack.c.l.s8.bf16 %v1833_v2 }
  0xfe   :  { %1523 = vmatprep.subr.bf16.mxu0 %v2618_v7  ;;  %1695 = vmatprep.subr.bf16.mxu1 %v2620_v8  ;;  %v1903_v5 = vunpack.c.l.s8.bf16 %v1835_v3  ;;  %v1908_v7 = vunpack.c.h.s8.bf16 %v1836_v61  ;;  %v1838_v8 = vld [vmem:[#allocation7 + $0x48] sm:$0xff]  ;;  %v1907_v11 = vunpack.c.h.s8.bf16 %v1835_v3 }
  0xff   :  { %v1910_v12 = vunpack.c.l.s8.bf16 %v1838_v8  ;;  %v1914_v18 = vunpack.c.h.s8.bf16 %v1838_v8 }
 0x101   :  { %1524 = vmatpush1.bf16.msra.mxu0 %v2617_v13  ;;  %1696 = vmatpush1.bf16.msra.mxu1 %v2619_v14  ;;  %v1912_v13 = vunpack.c.l.s8.bf16 %v1840_v9  ;;  %v1837_v14 = vld [vmem:[#allocation7 + $0x40] sm:$0xff] }
 0x102   :  { %1525 = vmatprep.subr.bf16.mxu0 %v2622_v15  ;;  %1697 = vmatprep.subr.bf16.mxu1 %v2624_v17  ;;  %v1839_v15 = vld [vmem:[#allocation7 + $0x50] sm:$0xff]  ;;  %v1909_v16 = vunpack.c.l.s8.bf16 %v1837_v14  ;;  %v1913_v22 = vunpack.c.h.s8.bf16 %v1837_v14 }
 0x103   :  { %v1911_v17 = vunpack.c.l.s8.bf16 %v1839_v15 }
 0x105   :  { %1526 = vmatpush1.bf16.msra.mxu0 %v2621_v23  ;;  %1698 = vmatpush1.bf16.msra.mxu1 %v2623_v24  ;;  %v1915_v23 = vunpack.c.h.s8.bf16 %v1839_v15  ;;  %v1918_v24 = vunpack.c.l.s8.bf16 %v1842_v20 }
 0x106   :  { %1527 = vmatprep.subr.bf16.mxu0 %v2626_v27  ;;  %1699 = vmatprep.subr.bf16.mxu1 %v2628_v28  ;;  %v1843_v27 = vld [vmem:[#allocation7 + $0x70] sm:$0xff]  ;;  %v1917_v28 = vunpack.c.l.s8.bf16 %v1841_v26 }
 0x107   :  { %v1919_v29 = vunpack.c.l.s8.bf16 %v1843_v27 }
 0x109   :  { %1528 = vmatpush1.bf16.msra.mxu0 %v2625_v33  ;;  %1700 = vmatpush1.bf16.msra.mxu1 %v2627_v34  ;;  %v1848_v33 = vld [vmem:[#allocation7 + $0x98] sm:$0xff]  ;;  %v1921_v34 = vunpack.c.h.s8.bf16 %v1841_v26 }
 0x10a   :  { %1529 = vmatprep.subr.bf16.mxu0 %v2630_v35  ;;  %1701 = vmatprep.subr.bf16.mxu1 %v2632_v37  ;;  %v1923_v35 = vunpack.c.h.s8.bf16 %v1843_v27  ;;  %v1928_v37 = vunpack.c.l.s8.bf16 %v1848_v33  ;;  %v1757_v26 = vld [vmem:[%s3049_s2] sm:$0xf] }
 0x10d   :  { %1530 = vmatpush1.bf16.msra.mxu0 %v2629_v41  ;;  %1702 = vmatpush1.bf16.msra.mxu1 %v2631_v42  ;;  %v1927_v41 = vunpack.c.l.s8.bf16 %v1847_v39  ;;  %v1930_v42 = vunpack.c.h.s8.bf16 %v1846_v32 }
 0x10e   :  { %1542 = vmatprep.subr.bf16.mxu0 %v2634_v43  ;;  %1714 = vmatprep.subr.bf16.mxu1 %v2636_v44  ;;  %v1932_v43 = vunpack.c.h.s8.bf16 %v1848_v33  ;;  %v1850_v44 = vld [vmem:[#allocation7 + $0xa8] sm:$0xff] }
 0x10f   :  { %v1938_v54 = vunpack.c.h.s8.bf16 %v1850_v44 }
 0x110   :  { %1532 = vmatmul.mubr.bf16.vlgmr.msra.gmra.mrb[0].mxu0 %v2735_v45  ;;  %1704 = vmatmul.mubr.bf16.vlgmr.msra.gmra.mrb[0].mxu1 %v2735_v45  ;;  %v1852_v45 = vld [vmem:[#allocation7 + $0xb8] sm:$0xff] }
 0x111   :  { %1543 = vmatpush1.bf16.msra.mxu0 %v2633_v48  ;;  %1715 = vmatpush1.bf16.msra.mxu1 %v2635_v49  ;;  %v1934_v48 = vunpack.c.l.s8.bf16 %v1850_v44  ;;  %v1936_v49 = vunpack.c.l.s8.bf16 %v1852_v45 }
 0x112   :  { %1574 = vmatprep.mubr.bf16.mxu0 %v2867_v52  ;;  %1746 = vmatprep.mubr.bf16.mxu1 %v2867_v52 }
 0x113   :  { %2021 = vmatprep.subr.bf16.mxu0 %v1894_v50  ;;  %2107 = vmatprep.subr.bf16.mxu1 %v1896_v51  ;;  %v1849_v50 = vld [vmem:[#allocation7 + $0xa0] sm:$0xff]  ;;  %v1851_v51 = vld [vmem:[#allocation7 + $0xb0] sm:$0xff] }
 0x114   :  { %v1933_v52 = vunpack.c.l.s8.bf16 %v1849_v50  ;;  %v1935_v53 = vunpack.c.l.s8.bf16 %v1851_v51 }
 0x11c   :  { %2637 = vmatmul.mubr.msk.bf16.vlgmr.msra.gmra.mrb[0].mxu0 %vm1409_vm0, %v2738_v55  ;;  %2638 = vmatmul.mubr.msk.bf16.vlgmr.msra.gmra.mrb[0].mxu1 %vm1409_vm0, %v2738_v55  ;;  %v1940_v55 = vunpack.c.h.s8.bf16 %v1852_v45 }
 0x11d   :  { %2022 = vmatpush1.bf16.msra.mxu0 %v1893_v56  ;;  %2108 = vmatpush1.bf16.msra.mxu1 %v1895_v57  ;;  %v1854_v56 = vld [vmem:[#allocation7 + $0xc8] sm:$0xff]  ;;  %v1856_v57 = vld [vmem:[#allocation7 + $0xd8] sm:$0xff] }
 0x11e   :  { %2023 = vmatprep.subr.bf16.mxu0 %v1898_v58  ;;  %2109 = vmatprep.subr.bf16.mxu1 %v1900_v59  ;;  %v1937_v58 = vunpack.c.h.s8.bf16 %v1849_v50  ;;  %v1939_v59 = vunpack.c.h.s8.bf16 %v1851_v51  ;;  %v1942_v60 = vunpack.c.l.s8.bf16 %v1854_v56  ;;  %v1944_v61 = vunpack.c.l.s8.bf16 %v1856_v57 }
 0x11f   :  { %v1946_v2 = vunpack.c.h.s8.bf16 %v1854_v56  ;;  %v1948_v3 = vunpack.c.h.s8.bf16 %v1856_v57 }
 0x121   :  { %2024 = vmatpush1.bf16.msra.mxu0 %v1897_v62  ;;  %2110 = vmatpush1.bf16.msra.mxu1 %v1899_v63  ;;  %v1853_v62 = vld [vmem:[#allocation7 + $0xc0] sm:$0xff]  ;;  %v1855_v63 = vld [vmem:[#allocation7 + $0xd0] sm:$0xff] }
 0x122   :  { %2025 = vmatprep.subr.bf16.mxu0 %v1902_v0  ;;  %2111 = vmatprep.subr.bf16.mxu1 %v1904_v1  ;;  %v1941_v0 = vunpack.c.l.s8.bf16 %v1853_v62  ;;  %v1943_v1 = vunpack.c.l.s8.bf16 %v1855_v63 }
 0x125   :  { %2026 = vmatpush1.bf16.msra.mxu0 %v1901_v4  ;;  %2112 = vmatpush1.bf16.msra.mxu1 %v1903_v5  ;;  %v1945_v4 = vunpack.c.h.s8.bf16 %v1853_v62  ;;  %v1947_v5 = vunpack.c.h.s8.bf16 %v1855_v63 }
 0x126   :  { %2027 = vmatprep.subr.bf16.mxu0 %v1906_v6  ;;  %2113 = vmatprep.subr.bf16.mxu1 %v1908_v7  ;;  %v1858_v6 = vld [vmem:[#allocation7 + $0xe8] sm:$0xff]  ;;  %v1860_v7 = vld [vmem:[#allocation7 + $0xf8] sm:$0xff] }
 0x127   :  { %v1950_v8 = vunpack.c.l.s8.bf16 %v1858_v6  ;;  %v1952_v9 = vunpack.c.l.s8.bf16 %v1860_v7  ;;  %v1954_v14 = vunpack.c.h.s8.bf16 %v1858_v6  ;;  %v1956_v15 = vunpack.c.h.s8.bf16 %v1860_v7 }
 0x129   :  { %2028 = vmatpush1.bf16.msra.mxu0 %v1905_v10  ;;  %2114 = vmatpush1.bf16.msra.mxu1 %v1907_v11  ;;  %v1857_v10 = vld [vmem:[#allocation7 + $0xe0] sm:$0xff]  ;;  %v1859_v11 = vld [vmem:[#allocation7 + $0xf0] sm:$0xff] }
 0x12a   :  { %2029 = vmatprep.subr.bf16.mxu0 %v1910_v12  ;;  %2115 = vmatprep.subr.bf16.mxu1 %v1912_v13  ;;  %v1949_v12 = vunpack.c.l.s8.bf16 %v1857_v10  ;;  %v1951_v13 = vunpack.c.l.s8.bf16 %v1859_v11 }
 0x12d   :  { %2030 = vmatpush1.bf16.msra.mxu0 %v1909_v16  ;;  %2116 = vmatpush1.bf16.msra.mxu1 %v1911_v17  ;;  %v1953_v16 = vunpack.c.h.s8.bf16 %v1857_v10  ;;  %v1955_v17 = vunpack.c.h.s8.bf16 %v1859_v11 }
 0x12e   :  { %2031 = vmatprep.subr.bf16.mxu0 %v1914_v18  ;;  %2117 = vmatprep.subr.bf16.mxu1 %v1916_v19  ;;  %v2978_v18 = vld [vmem:[#allocation7 + $0x108] sm:$0xff]  ;;  %v2980_v19 = vld [vmem:[#allocation7 + $0x118] sm:$0xff] }
 0x12f   :  { %v1958_v20 = vunpack.c.l.s8.bf16 %v2978_v18  ;;  %v1960_v21 = vunpack.c.l.s8.bf16 %v2980_v19 }
 0x131   :  { %2032 = vmatpush1.bf16.msra.mxu0 %v1913_v22  ;;  %2118 = vmatpush1.bf16.msra.mxu1 %v1915_v23  ;;  %v1759_v22 = vlaneseq }
 0x132   :  { %2033 = vmatprep.subr.bf16.mxu0 %v1918_v24  ;;  %2119 = vmatprep.subr.bf16.mxu1 %v1920_v25 }
 0x133   :  { %v1760_v23 = vshrl.u32 %v1759_v22, 7 }
 0x135   :  { %2034 = vmatpush1.bf16.msra.mxu0 %v1917_v28  ;;  %2120 = vmatpush1.bf16.msra.mxu1 %v1919_v29  ;;  %v2984_v24 = vsub.s32 0, %v1760_v23  ;;  %v2986_v25 = vsub.s32 2, %v1760_v23  ;;  %v2991_v27 = vsub.s32 1, %v1760_v23  ;;  %v2993_v28 = vsub.s32 3, %v1760_v23  ;;  %v1787_v29 = vld [vmem:[%s3050_s3] sm:$0xf] }
 0x136   :  { %2035 = vmatprep.subr.bf16.mxu0 %v1922_v30  ;;  %2121 = vmatprep.subr.bf16.mxu1 %v1924_v31 }
 0x137   :  { %v1762_v30 = vrot.slane %v1757_v26, %v2984_v24  ;;  %v1770_v31 = vrot.slane %v1757_v26, %v2986_v25  ;;  %v1766_v32 = vrot.slane %v1757_v26, %v2991_v27  ;;  %v1774_v33 = vrot.slane %v1757_v26, %v2993_v28  ;;  %v1865_v26 = vld [vmem:[#allocation7 + $0x120] sm:$0xff] }
 0x138   :  { %v1796_v38 = vrot.slane %v1787_v29, %v2991_v27  ;;  %v1804_v39 = vrot.slane %v1787_v29, %v2993_v28 }
 0x139   :  { %2036 = vmatpush1.bf16.msra.mxu0 %v1921_v34  ;;  %2122 = vmatpush1.bf16.msra.mxu1 %v1923_v35  ;;  %v1792_v34 = vrot.slane %v1787_v29, %v2984_v24  ;;  %v1800_v35 = vrot.slane %v1787_v29, %v2986_v25  ;;  %v1867_v29 = vld [vmem:[#allocation7 + $0x130] sm:$0xff] }
 0x13a   :  { %2037 = vmatprep.subr.bf16.mxu0 %v1926_v36  ;;  %2123 = vmatprep.subr.bf16.mxu1 %v1928_v37 }
 0x13d   :  { %2038 = vmatpush1.bf16.msra.mxu0 %v1925_v40  ;;  %2124 = vmatpush1.bf16.msra.mxu1 %v1927_v41 }
 0x13e   :  { %2039 = vmatprep.subr.bf16.mxu0 %v1930_v42  ;;  %2125 = vmatprep.subr.bf16.mxu1 %v1932_v43 }
 0x141   :  { %2040 = vmatpush1.bf16.msra.mxu0 %v1929_v46  ;;  %2126 = vmatpush1.bf16.msra.mxu1 %v1931_v47 }
 0x142   :  { %2041 = vmatprep.subr.bf16.mxu0 %v1934_v48  ;;  %2127 = vmatprep.subr.bf16.mxu1 %v1936_v49 }
 0x145   :  { %2042 = vmatpush1.bf16.msra.mxu0 %v1933_v52  ;;  %2128 = vmatpush1.bf16.msra.mxu1 %v1935_v53 }
 0x146   :  { %2043 = vmatprep.subr.bf16.mxu0 %v1938_v54  ;;  %2129 = vmatprep.subr.bf16.mxu1 %v1940_v55 }
 0x149   :  { %2044 = vmatpush1.bf16.msra.mxu0 %v1937_v58  ;;  %2130 = vmatpush1.bf16.msra.mxu1 %v1939_v59 }
 0x14a   :  { %2045 = vmatprep.subr.bf16.mxu0 %v1942_v60  ;;  %2131 = vmatprep.subr.bf16.mxu1 %v1944_v61 }
 0x14d   :  { %2046 = vmatpush1.bf16.msra.mxu0 %v1941_v0  ;;  %2132 = vmatpush1.bf16.msra.mxu1 %v1943_v1 }
 0x14e   :  { %2047 = vmatprep.subr.bf16.mxu0 %v1946_v2  ;;  %2133 = vmatprep.subr.bf16.mxu1 %v1948_v3  ;;  %v1861_v2 = vld [vmem:[#allocation7 + $0x100] sm:$0xff]  ;;  %v1863_v3 = vld [vmem:[#allocation7 + $0x110] sm:$0xff] }
 0x14f   :  { %v1957_v11 = vunpack.c.l.s8.bf16 %v1861_v2 }
 0x151   :  { %2048 = vmatpush1.bf16.msra.mxu0 %v1945_v4  ;;  %2134 = vmatpush1.bf16.msra.mxu1 %v1947_v5 }
 0x152   :  { %2049 = vmatprep.subr.bf16.mxu0 %v1950_v8  ;;  %2135 = vmatprep.subr.bf16.mxu1 %v1952_v9 }
 0x155   :  { %2050 = vmatpush1.bf16.msra.mxu0 %v1949_v12  ;;  %2136 = vmatpush1.bf16.msra.mxu1 %v1951_v13  ;;  %v1959_v12 = vunpack.c.l.s8.bf16 %v1863_v3 }
 0x156   :  { %2051 = vmatprep.subr.bf16.mxu0 %v1954_v14  ;;  %2137 = vmatprep.subr.bf16.mxu1 %v1956_v15  ;;  %v1962_v14 = vunpack.c.h.s8.bf16 %v2978_v18  ;;  %v1964_v15 = vunpack.c.h.s8.bf16 %v2980_v19  ;;  %v1965_v18 = vunpack.c.l.s8.bf16 %v1865_v26  ;;  %v1967_v19 = vunpack.c.l.s8.bf16 %v1867_v29 }
 0x159   :  { %2052 = vmatpush1.bf16.msra.mxu0 %v1953_v16  ;;  %2138 = vmatpush1.bf16.msra.mxu1 %v1955_v17  ;;  %v1866_v16 = vld [vmem:[#allocation7 + $0x128] sm:$0xff]  ;;  %v1868_v17 = vld [vmem:[#allocation7 + $0x138] sm:$0xff] }
 0x15a   :  { %2064 = vmatprep.subr.bf16.mxu0 %v1958_v20  ;;  %2150 = vmatprep.subr.bf16.mxu1 %v1960_v21  ;;  %v1961_v20 = vunpack.c.h.s8.bf16 %v1861_v2  ;;  %v1963_v21 = vunpack.c.h.s8.bf16 %v1863_v3  ;;  %v1966_v22 = vunpack.c.l.s8.bf16 %v1866_v16  ;;  %v1968_v23 = vunpack.c.l.s8.bf16 %v1868_v17 }
 0x1ef   :  { %v1576_v36 = vpop.f32.mrb[0].mxu0  ;;  %v1748_v37 = vpop.f32.mrb[0].mxu1 }
 0x1f0   :  { %v1779_v40 = vmul.f32 %v1762_v30, %v1576_v36  ;;  %v1781_v41 = vmul.f32 %v1770_v31, %v1748_v37  ;;  %v1578_v42 = vpop.f32.mrb[1].mxu0  ;;  %v1750_v43 = vpop.f32.mrb[1].mxu1 }
 0x1f1   :  { %v1780_v44 = vmul.f32 %v1766_v32, %v1578_v42  ;;  %v1782_v45 = vmul.f32 %v1774_v33, %v1750_v43  ;;  %v1580_v46 = vpop.f32.mrb[2].mxu0  ;;  %v1752_v47 = vpop.f32.mrb[2].mxu1 }
 0x1f2   :  { %v1809_v48 = vadd.f32 %v1792_v34, %v1779_v40  ;;  %v1811_v49 = vadd.f32 %v1800_v35, %v1781_v41  ;;  %v1783_v50 = vmul.f32 %v1762_v30, %v1580_v46  ;;  %v1785_v51 = vmul.f32 %v1770_v31, %v1752_v47  ;;  %v1582_v52 = vpop.f32.mrb[3].mxu0  ;;  %v1754_v53 = vpop.f32.mrb[3].mxu1 }
 0x1f3   :  { %v1810_v54 = vadd.f32 %v1796_v38, %v1780_v44  ;;  %v1812_v55 = vadd.f32 %v1804_v39, %v1782_v45  ;;  %v1784_v56 = vmul.f32 %v1766_v32, %v1582_v52  ;;  %v1786_v57 = vmul.f32 %v1774_v33, %v1754_v53  ;;  %v1870_v32 = vld [vmem:[#allocation7 + $0x148] sm:$0xff]  ;;  %v1872_v33 = vld [vmem:[#allocation7 + $0x158] sm:$0xff] }
 0x1f4   :  { %v1813_v58 = vadd.f32 %v1792_v34, %v1783_v50  ;;  %v1815_v59 = vadd.f32 %v1800_v35, %v1785_v51  ;;  %v1817_v62 = vmax.f32 %v1809_v48, 0.0  ;;  %v1819_v63 = vmax.f32 %v1811_v49, 0.0  ;;  %v1874_v44 = vld [vmem:[#allocation7 + $0x168] sm:$0xff]  ;;  %v1876_v45 = vld [vmem:[#allocation7 + $0x178] sm:$0xff]  ;;  %v1873_v50 = vld [vmem:[#allocation7 + $0x160] sm:$0xff] }
 0x1f5   :  { %v1814_v60 = vadd.f32 %v1796_v38, %v1784_v56  ;;  %v1816_v61 = vadd.f32 %v1804_v39, %v1786_v57  ;;  %v1818_v4 = vmax.f32 %v1810_v54, 0.0  ;;  %v1820_v5 = vmax.f32 %v1812_v55, 0.0  ;;  %v1869_v38 = vld [vmem:[#allocation7 + $0x140] sm:$0xff]  ;;  %v1871_v39 = vld [vmem:[#allocation7 + $0x150] sm:$0xff]  ;;  %v1878_v56 = vld [vmem:[#allocation7 + $0x188] sm:$0xff] }
 0x1f6   :  { %v1821_v0 = vmax.f32 %v1813_v58, 0.0  ;;  %v1823_v1 = vmax.f32 %v1815_v59, 0.0  ;;  %v1970_v30 = vunpack.c.h.s8.bf16 %v1866_v16  ;;  %v1972_v31 = vunpack.c.h.s8.bf16 %v1868_v17  ;;  %v1875_v51 = vld [vmem:[#allocation7 + $0x170] sm:$0xff]  ;;  %v1880_v57 = vld [vmem:[#allocation7 + $0x198] sm:$0xff]  ;;  %v1886_v17 = vld [vmem:[#allocation7 + $0x1c8] sm:$0xff] }
 0x1f7   :  { %v1822_v6 = vmax.f32 %v1814_v60, 0.0  ;;  %v1824_v7 = vmax.f32 %v1816_v61, 0.0  ;;  %v1969_v34 = vunpack.c.h.s8.bf16 %v1865_v26  ;;  %v1971_v35 = vunpack.c.h.s8.bf16 %v1867_v29  ;;  %v1885_v29 = vld [vmem:[#allocation7 + $0x1c0] sm:$0xff] }
 0x1f8   :  { %v1825_v8 = vpack.c.bf16 %v1821_v0, %v1817_v62  ;;  %v3006_v9 = vpack.c.bf16 %v1823_v1, %v1819_v63  ;;  %v1974_v36 = vunpack.c.l.s8.bf16 %v1870_v32  ;;  %v1976_v37 = vunpack.c.l.s8.bf16 %v1872_v33  ;;  %v1877_v62 = vld [vmem:[#allocation7 + $0x180] sm:$0xff]  ;;  %v1879_v63 = vld [vmem:[#allocation7 + $0x190] sm:$0xff] }
 0x1f9   :  { %v1826_v10 = vpack.c.bf16 %v1822_v6, %v1818_v4  ;;  %v1828_v13 = vpack.c.bf16 %v1824_v7, %v1820_v5  ;;  %v1973_v40 = vunpack.c.l.s8.bf16 %v1869_v38  ;;  %v1975_v41 = vunpack.c.l.s8.bf16 %v1871_v39  ;;  %v1882_v4 = vld [vmem:[#allocation7 + $0x1a8] sm:$0xff]  ;;  %v1884_v5 = vld [vmem:[#allocation7 + $0x1b8] sm:$0xff] }
 0x1fa   :  { %v1978_v42 = vunpack.c.h.s8.bf16 %v1870_v32  ;;  %v1980_v43 = vunpack.c.h.s8.bf16 %v1872_v33  ;;  %v1977_v46 = vunpack.c.h.s8.bf16 %v1869_v38  ;;  %v1979_v47 = vunpack.c.h.s8.bf16 %v1871_v39  ;;  %v1890_v33 = vld [vmem:[#allocation7 + $0x1e8] sm:$0xff]  ;;  %v1889_v39 = vld [vmem:[#allocation7 + $0x1e0] sm:$0xff] }
 0x1fb   :  { %2053 = vmatprep.mubr.bf16.mxu0 %v1826_v10  ;;  %2139 = vmatprep.mubr.bf16.mxu1 %v1826_v10  ;;  %v1982_v48 = vunpack.c.l.s8.bf16 %v1874_v44  ;;  %v1984_v49 = vunpack.c.l.s8.bf16 %v1876_v45  ;;  %v1981_v52 = vunpack.c.l.s8.bf16 %v1873_v50  ;;  %v1983_v53 = vunpack.c.l.s8.bf16 %v1875_v51 }
 0x1fc   :  { %2054 = vmatmul.mubr.bf16.vlgmr.msra.gmra.mrb[4].mxu0 %v1825_v8  ;;  %2140 = vmatmul.mubr.bf16.vlgmr.msra.gmra.mrb[4].mxu1 %v1825_v8  ;;  %v1986_v54 = vunpack.c.h.s8.bf16 %v1874_v44  ;;  %v1988_v55 = vunpack.c.h.s8.bf16 %v1876_v45  ;;  %v1985_v58 = vunpack.c.h.s8.bf16 %v1873_v50  ;;  %v1987_v59 = vunpack.c.h.s8.bf16 %v1875_v51  ;;  %v2269_v45 = vld [vmem:[#allocation8 + $0x20] sm:$0xff] }
 0x1fd   :  { %2065 = vmatpush1.bf16.msra.mxu0 %v1957_v11  ;;  %2151 = vmatpush1.bf16.msra.mxu1 %v1959_v12  ;;  %v1990_v60 = vunpack.c.l.s8.bf16 %v1878_v56  ;;  %v1992_v61 = vunpack.c.l.s8.bf16 %v1880_v57  ;;  %v1989_v0 = vunpack.c.l.s8.bf16 %v1877_v62  ;;  %v1991_v1 = vunpack.c.l.s8.bf16 %v1879_v63  ;;  %v1881_v11 = vld [vmem:[#allocation7 + $0x1a0] sm:$0xff]  ;;  %v1883_v12 = vld [vmem:[#allocation7 + $0x1b0] sm:$0xff] }
 0x1fe   :  { %2096 = vmatprep.mubr.bf16.mxu0 %v1828_v13  ;;  %2182 = vmatprep.mubr.bf16.mxu1 %v1828_v13  ;;  %v1994_v2 = vunpack.c.h.s8.bf16 %v1878_v56  ;;  %v1996_v3 = vunpack.c.h.s8.bf16 %v1880_v57  ;;  %v1993_v6 = vunpack.c.h.s8.bf16 %v1877_v62  ;;  %v1995_v7 = vunpack.c.h.s8.bf16 %v1879_v63  ;;  %v2265_v51 = vld [vmem:[#allocation8] sm:$0xff]  ;;  %v2270_v57 = vld [vmem:[#allocation8 + $0x28] sm:$0xff] }
 0x1ff   :  { %2066 = vmatprep.subr.bf16.mxu0 %v1962_v14  ;;  %2152 = vmatprep.subr.bf16.mxu1 %v1964_v15  ;;  %v1998_v8 = vunpack.c.l.s8.bf16 %v1882_v4  ;;  %v2000_v10 = vunpack.c.l.s8.bf16 %v1884_v5  ;;  %v1997_v13 = vunpack.c.l.s8.bf16 %v1881_v11  ;;  %v1999_v14 = vunpack.c.l.s8.bf16 %v1883_v12  ;;  %v2266_v63 = vld [vmem:[#allocation8 + $0x8] sm:$0xff] }
 0x200   :  { %v2002_v15 = vunpack.c.h.s8.bf16 %v1882_v4  ;;  %v2004_v16 = vunpack.c.h.s8.bf16 %v1884_v5  ;;  %v2271_v5 = vld [vmem:[#allocation8 + $0x30] sm:$0xff] }
 0x201   :  { %2067 = vmatpush1.bf16.msra.mxu0 %v1961_v20  ;;  %2153 = vmatpush1.bf16.msra.mxu1 %v1963_v21  ;;  %v1888_v20 = vld [vmem:[#allocation7 + $0x1d8] sm:$0xff]  ;;  %v2001_v21 = vunpack.c.h.s8.bf16 %v1881_v11  ;;  %v2267_v11 = vld [vmem:[#allocation8 + $0x10] sm:$0xff] }
 0x202   :  { %2068 = vmatprep.subr.bf16.mxu0 %v1966_v22  ;;  %2154 = vmatprep.subr.bf16.mxu1 %v1968_v23  ;;  %v2003_v22 = vunpack.c.h.s8.bf16 %v1883_v12  ;;  %v2006_v23 = vunpack.c.l.s8.bf16 %v1886_v17  ;;  %v2008_v26 = vunpack.c.l.s8.bf16 %v1888_v20  ;;  %v2012_v32 = vunpack.c.h.s8.bf16 %v1888_v20  ;;  %v2275_v12 = vld [vmem:[#allocation8 + $0x50] sm:$0xff] }
 0x203   :  { %v2302_v20 = vunpack.c.h.s8.bf16 %v2275_v12 }
 0x205   :  { %2069 = vmatpush1.bf16.msra.mxu0 %v1965_v18  ;;  %2155 = vmatpush1.bf16.msra.mxu1 %v1967_v19  ;;  %v1887_v18 = vld [vmem:[#allocation7 + $0x1d0] sm:$0xff]  ;;  %v2005_v19 = vunpack.c.l.s8.bf16 %v1885_v29 }
 0x206   :  { %2070 = vmatprep.subr.bf16.mxu0 %v1970_v30  ;;  %2156 = vmatprep.subr.bf16.mxu1 %v1972_v31  ;;  %v2007_v30 = vunpack.c.l.s8.bf16 %v1887_v18  ;;  %v2010_v31 = vunpack.c.h.s8.bf16 %v1886_v17  ;;  %v2286_v17 = vunpack.c.h.s8.bf16 %v2267_v11 }
 0x209   :  { %2071 = vmatpush1.bf16.msra.mxu0 %v1969_v34  ;;  %2157 = vmatpush1.bf16.msra.mxu1 %v1971_v35  ;;  %v1892_v34 = vld [vmem:[#allocation7 + $0x1f8] sm:$0xff]  ;;  %v2009_v35 = vunpack.c.h.s8.bf16 %v1885_v29 }
 0x20a   :  { %2072 = vmatprep.subr.bf16.mxu0 %v1974_v36  ;;  %2158 = vmatprep.subr.bf16.mxu1 %v1976_v37  ;;  %v2011_v36 = vunpack.c.h.s8.bf16 %v1887_v18  ;;  %v2014_v37 = vunpack.c.l.s8.bf16 %v1890_v33  ;;  %v2016_v38 = vunpack.c.l.s8.bf16 %v1892_v34  ;;  %v2020_v44 = vunpack.c.h.s8.bf16 %v1892_v34  ;;  %v2268_v29 = vld [vmem:[#allocation8 + $0x18] sm:$0xff] }
 0x20b   :  { %v2276_v18 = vld [vmem:[#allocation8 + $0x58] sm:$0xff] }
 0x20c   :  { %v2304_v34 = vunpack.c.h.s8.bf16 %v2276_v18 }
 0x20d   :  { %2073 = vmatpush1.bf16.msra.mxu0 %v1973_v40  ;;  %2159 = vmatpush1.bf16.msra.mxu1 %v1975_v41  ;;  %v1891_v40 = vld [vmem:[#allocation7 + $0x1f0] sm:$0xff]  ;;  %v2013_v41 = vunpack.c.l.s8.bf16 %v1889_v39 }
 0x20e   :  { %2074 = vmatprep.subr.bf16.mxu0 %v1978_v42  ;;  %2160 = vmatprep.subr.bf16.mxu1 %v1980_v43  ;;  %v2015_v42 = vunpack.c.l.s8.bf16 %v1891_v40  ;;  %v2018_v43 = vunpack.c.h.s8.bf16 %v1890_v33  ;;  %v2288_v33 = vunpack.c.h.s8.bf16 %v2268_v29 }
 0x211   :  { %2075 = vmatpush1.bf16.msra.mxu0 %v1977_v46  ;;  %2161 = vmatpush1.bf16.msra.mxu1 %v1979_v47  ;;  %v2277_v46 = vld [vmem:[#allocation8 + $0x60] sm:$0xff]  ;;  %v2017_v47 = vunpack.c.h.s8.bf16 %v1889_v39 }
 0x212   :  { %2076 = vmatprep.subr.bf16.mxu0 %v1982_v48  ;;  %2162 = vmatprep.subr.bf16.mxu1 %v1984_v49  ;;  %v2019_v48 = vunpack.c.h.s8.bf16 %v1891_v40  ;;  %v2289_v49 = vunpack.c.l.s8.bf16 %v2269_v45  ;;  %v2305_v50 = vunpack.c.l.s8.bf16 %v2277_v46  ;;  %v2306_v56 = vunpack.c.h.s8.bf16 %v2277_v46 }
 0x215   :  { %2077 = vmatpush1.bf16.msra.mxu0 %v1981_v52  ;;  %2163 = vmatpush1.bf16.msra.mxu1 %v1983_v53  ;;  %v2273_v52 = vld [vmem:[#allocation8 + $0x40] sm:$0xff]  ;;  %v2281_v53 = vunpack.c.l.s8.bf16 %v2265_v51 }
 0x216   :  { %2078 = vmatprep.subr.bf16.mxu0 %v1986_v54  ;;  %2164 = vmatprep.subr.bf16.mxu1 %v1988_v55  ;;  %v2297_v54 = vunpack.c.l.s8.bf16 %v2273_v52  ;;  %v2290_v55 = vunpack.c.h.s8.bf16 %v2269_v45 }
 0x219   :  { %2079 = vmatpush1.bf16.msra.mxu0 %v1985_v58  ;;  %2165 = vmatpush1.bf16.msra.mxu1 %v1987_v59  ;;  %v2278_v58 = vld [vmem:[#allocation8 + $0x68] sm:$0xff]  ;;  %v2282_v59 = vunpack.c.h.s8.bf16 %v2265_v51 }
 0x21a   :  { %2080 = vmatprep.subr.bf16.mxu0 %v1990_v60  ;;  %2166 = vmatprep.subr.bf16.mxu1 %v1992_v61  ;;  %v2298_v60 = vunpack.c.h.s8.bf16 %v2273_v52  ;;  %v2291_v61 = vunpack.c.l.s8.bf16 %v2270_v57  ;;  %v2307_v62 = vunpack.c.l.s8.bf16 %v2278_v58  ;;  %v2308_v4 = vunpack.c.h.s8.bf16 %v2278_v58 }
 0x21d   :  { %2081 = vmatpush1.bf16.msra.mxu0 %v1989_v0  ;;  %2167 = vmatpush1.bf16.msra.mxu1 %v1991_v1  ;;  %v2274_v0 = vld [vmem:[#allocation8 + $0x48] sm:$0xff]  ;;  %v2283_v1 = vunpack.c.l.s8.bf16 %v2266_v63 }
 0x21e   :  { %2082 = vmatprep.subr.bf16.mxu0 %v1994_v2  ;;  %2168 = vmatprep.subr.bf16.mxu1 %v1996_v3  ;;  %v2299_v2 = vunpack.c.l.s8.bf16 %v2274_v0  ;;  %v2292_v3 = vunpack.c.h.s8.bf16 %v2270_v57 }
 0x221   :  { %2083 = vmatpush1.bf16.msra.mxu0 %v1993_v6  ;;  %2169 = vmatpush1.bf16.msra.mxu1 %v1995_v7  ;;  %v2284_v6 = vunpack.c.h.s8.bf16 %v2266_v63  ;;  %v2300_v7 = vunpack.c.h.s8.bf16 %v2274_v0 }
 0x222   :  { %2084 = vmatprep.subr.bf16.mxu0 %v1998_v8  ;;  %2170 = vmatprep.subr.bf16.mxu1 %v2000_v10  ;;  %v2293_v8 = vunpack.c.l.s8.bf16 %v2271_v5 }
 0x225   :  { %2085 = vmatpush1.bf16.msra.mxu0 %v1997_v13  ;;  %2171 = vmatpush1.bf16.msra.mxu1 %v1999_v14  ;;  %v2285_v13 = vunpack.c.l.s8.bf16 %v2267_v11  ;;  %v2301_v14 = vunpack.c.l.s8.bf16 %v2275_v12 }
 0x226   :  { %2086 = vmatprep.subr.bf16.mxu0 %v2002_v15  ;;  %2172 = vmatprep.subr.bf16.mxu1 %v2004_v16  ;;  %v2294_v15 = vunpack.c.h.s8.bf16 %v2271_v5 }
 0x229   :  { %2087 = vmatpush1.bf16.msra.mxu0 %v2001_v21  ;;  %2173 = vmatpush1.bf16.msra.mxu1 %v2003_v22  ;;  %v2272_v21 = vld [vmem:[#allocation8 + $0x38] sm:$0xff] }
 0x22a   :  { %2088 = vmatprep.subr.bf16.mxu0 %v2006_v23  ;;  %2174 = vmatprep.subr.bf16.mxu1 %v2008_v26  ;;  %v2280_v22 = vld [vmem:[#allocation8 + $0x78] sm:$0xff]  ;;  %v2295_v23 = vunpack.c.l.s8.bf16 %v2272_v21 }
 0x22b   :  { %v2311_v26 = vunpack.c.l.s8.bf16 %v2280_v22 }
 0x22d   :  { %2089 = vmatpush1.bf16.msra.mxu0 %v2005_v19  ;;  %2175 = vmatpush1.bf16.msra.mxu1 %v2007_v30  ;;  %v2287_v19 = vunpack.c.l.s8.bf16 %v2268_v29  ;;  %v2303_v30 = vunpack.c.l.s8.bf16 %v2276_v18 }
 0x22e   :  { %2090 = vmatprep.subr.bf16.mxu0 %v2010_v31  ;;  %2176 = vmatprep.subr.bf16.mxu1 %v2012_v32  ;;  %v2296_v31 = vunpack.c.h.s8.bf16 %v2272_v21  ;;  %v2312_v32 = vunpack.c.h.s8.bf16 %v2280_v22 }
 0x231   :  { %2091 = vmatpush1.bf16.msra.mxu0 %v2009_v35  ;;  %2177 = vmatpush1.bf16.msra.mxu1 %v2011_v36  ;;  %v2193_v35 = vld [vmem:[%s3052_s5] sm:$0xf] }
 0x232   :  { %2092 = vmatprep.subr.bf16.mxu0 %v2014_v37  ;;  %2178 = vmatprep.subr.bf16.mxu1 %v2016_v38  ;;  %v2223_v36 = vld [vmem:[%s3053_s6] sm:$0xf]  ;;  %v2198_v37 = vrot.slane %v2193_v35, %v2984_v24  ;;  %v2206_v38 = vrot.slane %v2193_v35, %v2986_v25  ;;  %v2202_v39 = vrot.slane %v2193_v35, %v2991_v27 }
 0x233   :  { %v2210_v40 = vrot.slane %v2193_v35, %v2993_v28  ;;  %v2232_v45 = vrot.slane %v2223_v36, %v2991_v27  ;;  %v2240_v46 = vrot.slane %v2223_v36, %v2993_v28 }
 0x235   :  { %2093 = vmatpush1.bf16.msra.mxu0 %v2013_v41  ;;  %2179 = vmatpush1.bf16.msra.mxu1 %v2015_v42  ;;  %v2228_v41 = vrot.slane %v2223_v36, %v2984_v24  ;;  %v2236_v42 = vrot.slane %v2223_v36, %v2986_v25 }
 0x236   :  { %2094 = vmatprep.subr.bf16.mxu0 %v2018_v43  ;;  %2180 = vmatprep.subr.bf16.mxu1 %v2020_v44 }
 0x239   :  { %2095 = vmatpush1.bf16.msra.mxu0 %v2017_v47  ;;  %2181 = vmatpush1.bf16.msra.mxu1 %v2019_v48 }
 0x23a   :  { %2641 = vmatprep.subr.bf16.mxu0 %v2289_v49  ;;  %2663 = vmatprep.subr.bf16.mxu1 %v2305_v50 }
 0x23c   :  { %2097 = vmatmul.mubr.bf16.vlgmr.msra.gmra.mrb[4].mxu0 %v3006_v9  ;;  %2183 = vmatmul.mubr.bf16.vlgmr.msra.gmra.mrb[4].mxu1 %v3006_v9  ;;  %v2279_v9 = vld [vmem:[#allocation8 + $0x70] sm:$0xff] }
 0x23d   :  { %2642 = vmatpush3.bf16.msra.mxu0 %v2281_v53  ;;  %2664 = vmatpush3.bf16.msra.mxu1 %v2297_v54  ;;  %v2309_v10 = vunpack.c.l.s8.bf16 %v2279_v9  ;;  %v2310_v16 = vunpack.c.h.s8.bf16 %v2279_v9 }
 0x23e   :  { %2643 = vmatprep.subr.bf16.mxu0 %v2290_v55  ;;  %2665 = vmatprep.subr.bf16.mxu1 %v2306_v56 }
 0x241   :  { %2644 = vmatpush3.bf16.msra.mxu0 %v2282_v59  ;;  %2666 = vmatpush3.bf16.msra.mxu1 %v2298_v60 }
 0x242   :  { %2645 = vmatprep.subr.bf16.mxu0 %v2291_v61  ;;  %2667 = vmatprep.subr.bf16.mxu1 %v2307_v62 }
 0x245   :  { %2646 = vmatpush3.bf16.msra.mxu0 %v2283_v1  ;;  %2668 = vmatpush3.bf16.msra.mxu1 %v2299_v2 }
 0x246   :  { %2647 = vmatprep.subr.bf16.mxu0 %v2292_v3  ;;  %2669 = vmatprep.subr.bf16.mxu1 %v2308_v4 }
 0x249   :  { %2648 = vmatpush3.bf16.msra.mxu0 %v2284_v6  ;;  %2670 = vmatpush3.bf16.msra.mxu1 %v2300_v7 }
 0x24a   :  { %2649 = vmatprep.subr.bf16.mxu0 %v2293_v8  ;;  %2671 = vmatprep.subr.bf16.mxu1 %v2309_v10 }
 0x24d   :  { %2650 = vmatpush3.bf16.msra.mxu0 %v2285_v13  ;;  %2672 = vmatpush3.bf16.msra.mxu1 %v2301_v14 }
 0x24e   :  { %2651 = vmatprep.subr.bf16.mxu0 %v2294_v15  ;;  %2673 = vmatprep.subr.bf16.mxu1 %v2310_v16 }
 0x251   :  { %2652 = vmatpush3.bf16.msra.mxu0 %v2286_v17  ;;  %2674 = vmatpush3.bf16.msra.mxu1 %v2302_v20 }
 0x252   :  { %2653 = vmatprep.subr.bf16.mxu0 %v2295_v23  ;;  %2675 = vmatprep.subr.bf16.mxu1 %v2311_v26  ;;  %v2639_v23 = vld [vmem:[%s3055_s8] ss:$0 sm:$0xff]  ;;  %s2827_s8 = scalar_lea.vmem %s2421_s15, 256 }
 0x253   :  { %p2828_p4 = scmp.ne.s32.totalorder %s2421_s15, %s2827_s8  ;;  %p2833_p6 = scmp.lt.s32.totalorder %s2827_s8, %s2827_s8 }
 0x255   :  { %2654 = vmatpush3.bf16.msra.mxu0 %v2287_v19  ;;  %2676 = vmatpush3.bf16.msra.mxu1 %v2303_v30  ;;  %p2834_p7 = por %p2833_p6, %p2832_p5 }
 0x256   :  { %2655 = vmatprep.subr.bf16.mxu0 %v2296_v31  ;;  %2677 = vmatprep.subr.bf16.mxu1 %v2312_v32  ;;  %v2640_v31 = vld [vmem:[%s3056_s9] ss:$0 sm:$0xff] }
 0x257   :  { %p2835_p8 = pnand %p2834_p7, %p2828_p4 }
 0x259   :  { %2656 = vmatpush3.bf16.msra.mxu0 %v2288_v33  ;;  %2678 = vmatpush3.bf16.msra.mxu1 %v2304_v34 }
 0x30f   :  { %v2098_v43 = vpop.f32.mrb[4].mxu0  ;;  %v2184_v44 = vpop.f32.mrb[4].mxu1 }
 0x310   :  { %v2215_v47 = vmul.f32 %v2198_v37, %v2098_v43  ;;  %v2217_v48 = vmul.f32 %v2206_v38, %v2184_v44  ;;  %v2100_v49 = vpop.f32.mrb[5].mxu0  ;;  %v2186_v50 = vpop.f32.mrb[5].mxu1 }
 0x311   :  { %v2216_v51 = vmul.f32 %v2202_v39, %v2100_v49  ;;  %v2218_v52 = vmul.f32 %v2210_v40, %v2186_v50  ;;  %v2102_v53 = vpop.f32.mrb[6].mxu0  ;;  %v2188_v54 = vpop.f32.mrb[6].mxu1 }
 0x312   :  { %v2245_v55 = vadd.f32 %v2228_v41, %v2215_v47  ;;  %v2247_v56 = vadd.f32 %v2236_v42, %v2217_v48  ;;  %v2219_v57 = vmul.f32 %v2198_v37, %v2102_v53  ;;  %v2221_v24 = vmul.f32 %v2206_v38, %v2188_v54  ;;  %v2104_v58 = vpop.f32.mrb[7].mxu0  ;;  %v2190_v25 = vpop.f32.mrb[7].mxu1 }
 0x313   :  { %v2246_v59 = vadd.f32 %v2232_v45, %v2216_v51  ;;  %v2248_v60 = vadd.f32 %v2240_v46, %v2218_v52  ;;  %v2220_v61 = vmul.f32 %v2202_v39, %v2104_v58  ;;  %v2222_v27 = vmul.f32 %v2210_v40, %v2190_v25 }
 0x314   :  { %v2249_v62 = vadd.f32 %v2228_v41, %v2219_v57  ;;  %v2251_v28 = vadd.f32 %v2236_v42, %v2221_v24  ;;  %v2253_v1 = vmax.f32 %v2245_v55, 0.0  ;;  %v2255_v2 = vmax.f32 %v2247_v56, 0.0 }
 0x315   :  { %v2250_v63 = vadd.f32 %v2232_v45, %v2220_v61  ;;  %v2252_v0 = vadd.f32 %v2240_v46, %v2222_v27  ;;  %v2254_v5 = vmax.f32 %v2246_v59, 0.0  ;;  %v2256_v9 = vmax.f32 %v2248_v60, 0.0 }
 0x316   :  { %v2257_v3 = vmax.f32 %v2249_v62, 0.0  ;;  %v2259_v4 = vmax.f32 %v2251_v28, 0.0 }
 0x317   :  { %v2258_v6 = vmax.f32 %v2250_v63, 0.0  ;;  %v2260_v7 = vmax.f32 %v2252_v0, 0.0 }
 0x318   :  { %v2261_v8 = vpack.c.bf16 %v2257_v3, %v2253_v1  ;;  %v2263_v10 = vpack.c.bf16 %v2259_v4, %v2255_v2 }
 0x319   :  { %v2262_v11 = vpack.c.bf16 %v2258_v6, %v2254_v5  ;;  %v2264_v12 = vpack.c.bf16 %v2260_v7, %v2256_v9 }
 0x31b   :  { %2345 = vmatprep.mubr.bf16.mxu0 %v2262_v11  ;;  %2386 = vmatprep.mubr.bf16.mxu1 %v2264_v12 }
 0x31c   :  { %2346 = vmatmul.mubr.bf16.vlgmr.msra.gmra.mrb[8].mxu0 %v2261_v8  ;;  %2387 = vmatmul.mubr.bf16.vlgmr.msra.gmra.mrb[8].mxu1 %v2263_v10 }
 0x3ef   :  { %v2657_v13 = vpop.f32.mrb[8].mxu0  ;;  %v2679_v14 = vpop.f32.mrb[8].mxu1 }
 0x3f0   :  { %v2658_v15 = vpop.f32.mrb[9].mxu0  ;;  %v2680_v16 = vpop.f32.mrb[9].mxu1 }
 0x3f1   :  { %v2659_v17 = vadd.f32 %v2658_v15, %v2657_v13  ;;  %v2681_v20 = vadd.f32 %v2680_v16, %v2679_v14  ;;  %v2660_v21 = vpop.f32.mrb[10].mxu0  ;;  %v2682_v22 = vpop.f32.mrb[10].mxu1 }
 0x3f2   :  { %v2661_v26 = vpop.f32.mrb[11].mxu0  ;;  %v2683_v29 = vpop.f32.mrb[11].mxu1 }
 0x3f3   :  { %v2389_v18 = vadd.f32 %v2681_v20, %v2659_v17  ;;  %v2662_v19 = vadd.f32 %v2661_v26, %v2660_v21  ;;  %v2684_v30 = vadd.f32 %v2683_v29, %v2682_v22 }
 0x3f5   :  { %v2402_v32 = vmul.f32 %v2639_v23, %v2389_v18  ;;  %v2392_v33 = vadd.f32 %v2684_v30, %v2662_v19 }
 0x3f7   :  { %v2403_v34 = vmul.f32 %v2639_v23, %v2392_v33  ;;  %v2411_v35 = vadd.f32 %v2640_v31, %v2402_v32 }
 0x3f9   :  { %v2412_v36 = vadd.f32 %v2640_v31, %v2403_v34  ;;  %2413 = vst [vmem:[#allocation10] sm:$0xff] %v2411_v35 }
 0x3fb   :  { %2414 = vst [vmem:[#allocation10 + $0x8] sm:$0xff] %v2412_v36 }
 0x3fc   :  { %2838 = shalt.err (!%p2835_p8)
}
 0x3fd   :  { %s2839_s9 = scalar_lea.hbm %s3057_s10, 256 }
 0x3fe   :  { %p2840_p9 = scmp.ne.s32.totalorder %s3057_s10, %s2839_s9  ;;  %p2843_p10 = scmp.lt.u32.totalorder %s2839_s9, %s3057_s10 }
 0x400   :  { %p2845_p11 = pnand %p2843_p10, %p2840_p9 }
 0x402   :  { %2848 = shalt.err (!%p2845_p11)
}
 0x403   :  { %2426 = dma.vmem_to_hbm [thread:$0]  %s2421_s15, 256, %s3057_s10, [#allocation4], %s2858_s23, %s2858_s23, %s2859_s24  }
 0x404   :  { %2855 = dma.done.wait [#allocation4], 256  }
 0x405   :  { %2856 = vsyncadd [#allocation4], 4294967040 }
 0x406   :  { %2430 = vsyncpa [#allocation3], 1 }
 0x407   :  { %2431 = vsyncpa [#allocation6], 1 }
 0x408   :  { %2432 = vsyncpa [#allocation9], 1 }
 0x409   :  { %2433 = vsyncpa [#allocation4], 1 }

</bundles_post_ra>
